<compile_context>
chip_gen: v5e
topology: v5e:2x2
jax: 0.10.0
libtpu: 0.0.40
codegen_flags: <defaults>
</compile_context>

<pallas_src>
import jax
import jax.numpy as jnp
from jax.experimental import pallas as pl
from jax.experimental.pallas import tpu as pltpu

# ----------------------------- configuration --------------------------------
IN_CH = 1          # input channels (grayscale crack images)
IMG = 16           # spatial size
H_SIZE = (8, 16)   # encoder hidden channel sizes
Z_DIM = 4          # latent dim (encoder emits 2*Z_DIM)
LEAKY = 0.01       # nn.LeakyReLU default negative_slope

LANE = 128
SUBLANE = 8
BLOCK_M_MAX = 1024   # row-tile cap (weights ~1.2 MiB, activations fit easily in VMEM)
VMEM_LIMIT = 48 << 20


def _round_up(x, m):
    return (x + m - 1) // m * m


# ----------------------- reference conv ops (setup / check) ------------------
def _conv_op(w, stride, pad):
    """PyTorch-semantics Conv2d (no bias): x NCHW, w (Cout, Cin, kh, kw)."""
    def op(x):
        return jax.lax.conv_general_dilated(
            x, w, window_strides=(stride, stride),
            padding=((pad, pad), (pad, pad)),
            dimension_numbers=("NCHW", "OIHW", "NCHW"))
    return op


def _conv_transpose_op(wt, stride, pad, out_pad):
    """PyTorch-semantics ConvTranspose2d (no bias): wt (Cin, Cout, kh, kw)."""
    w = jnp.flip(wt, axis=(2, 3)).transpose(1, 0, 2, 3)   # (Cout, Cin, kh, kw)
    kh, kw = int(wt.shape[2]), int(wt.shape[3])

    def op(x):
        return jax.lax.conv_general_dilated(
            x, w, window_strides=(1, 1),
            padding=((kh - 1 - pad, kh - 1 - pad + out_pad),
                     (kw - 1 - pad, kw - 1 - pad + out_pad)),
            lhs_dilation=(stride, stride),
            dimension_numbers=("NCHW", "OIHW", "NCHW"))
    return op


def _linearize(op, in_shape):
    """Return T (in_feat, out_feat) with channel-last (h, w, c) flattening so that
    flatten(op(x)) == flatten(x) @ T   for any x."""
    C, H, W = in_shape
    n_in = C * H * W
    basis = jnp.eye(n_in, dtype=jnp.float32).reshape(n_in, H, W, C).transpose(0, 3, 1, 2)
    out = op(basis)                                       # (n_in, C2, H2, W2)
    _, C2, H2, W2 = out.shape
    C2, H2, W2 = int(C2), int(H2), int(W2)
    T = out.transpose(0, 2, 3, 1).reshape(n_in, H2 * W2 * C2)
    return T, (C2, H2, W2)


# ------------------------- weight packing (done once) ------------------------
def pack_params(p):
    """Repack conv/convT weights into dense channel-last GEMM operators (bf16) and
    spatially-tiled f32 biases.  Runs once at setup time, not in the hot path."""
    layers = [
        (_conv_op(p["e1_w"], 2, 1), p["e1_b"], (IN_CH, IMG, IMG)),
        (_conv_op(p["e2_w"], 2, 1), p["e2_b"], (H_SIZE[0], IMG // 2, IMG // 2)),
        (_conv_op(p["ez_w"], 1, 0), p["ez_b"], (H_SIZE[1], IMG // 4, IMG // 4)),
        (_conv_transpose_op(p["d1_w"], 1, 0, 0), p["d1_b"], (Z_DIM, 1, 1)),
        (_conv_transpose_op(p["d2_w"], 2, 1, 1), p["d2_b"], (H_SIZE[1], IMG // 4, IMG // 4)),
        (_conv_transpose_op(p["d3_w"], 2, 1, 1), p["d3_b"], (H_SIZE[0], IMG // 2, IMG // 2)),
    ]
    mats = []
    for op, b, in_shape in layers:
        T, (C2, H2, W2) = _linearize(op, in_shape)
        b_full = jnp.tile(b.astype(jnp.float32), H2 * W2)   # (h*w, c) order, c fastest
        mats.append((T, b_full))

    (t1, b1), (t2, b2), (tz, bz), (t4, b4), (t5, b5), (t6, b6) = mats

    zp = LANE
    # to_1x1 layer: split mu / log_std halves (== torch.chunk(enc, 2, dim=1)), pad
    # each to 128 lanes with zero columns / zero-bias lanes, then MERGE them into a
    # single full-width (256 in, 256 out) GEMM so the MXU sees one 256-lane matmul
    # instead of two half-width ones.  Padded mu lanes stay exactly 0 and padded
    # log_std lanes stay exactly 0 (-> std = 1), so with eps padded to 0 the padded
    # z lanes are 0 going into the zero-padded T4 rows.
    tmu = jnp.pad(tz[:, :Z_DIM], ((0, 0), (0, zp - Z_DIM)))
    tls = jnp.pad(tz[:, Z_DIM:], ((0, 0), (0, zp - Z_DIM)))
    bmu = jnp.pad(bz[:Z_DIM], (0, zp - Z_DIM))
    bls = jnp.pad(bz[Z_DIM:], (0, zp - Z_DIM))
    t3 = jnp.concatenate([tmu, tls], axis=1)              # (256, 256)
    b3 = jnp.concatenate([bmu, bls])                       # (256,)
    # decoder input consumes the padded latent lanes -> zero-pad its K rows
    t4 = jnp.pad(t4, ((0, zp - Z_DIM), (0, 0)))

    def wb(t, b):
        # weights bf16 (MXU-native on v6e/v7x), biases f32 for the f32 epilogue
        return t.astype(jnp.bfloat16), b.astype(jnp.float32).reshape(1, -1)

    return (wb(t1, b1) + wb(t2, b2) + wb(t3, b3)
            + wb(t4, b4) + wb(t5, b5) + wb(t6, b6))


# ----------------------------- fused Pallas kernel ---------------------------
def _vae_fused_kernel(x_ref, eps_ref,
                      t1, b1, t2, b2, t3, b3,
                      t4, b4, t5, b5, t6, b6,
                      xrec_ref, mustd_ref):
    def dense(a, t_ref, b_ref):
        # bf16 x bf16 MXU matmul, f32 accumulation, f32 bias epilogue
        # (astype is a no-op when `a` is already bf16)
        return jnp.dot(a.astype(jnp.bfloat16), t_ref[...],
                       preferred_element_type=jnp.float32) + b_ref[...]

    def leaky_bf16(a):
        # LeakyReLU == max(a, slope*a) for 0 < slope < 1: mul + max (2 VALU ops).
        # Cast the inter-layer intermediate to bf16 ONCE so the (bm, 512) activations
        # don't spill as f32 between GEMMs.
        return jnp.maximum(a, LEAKY * a).astype(jnp.bfloat16)

    h = x_ref[...]                        # (bm, 256) bf16, channel-last flat
    h = leaky_bf16(dense(h, t1, b1))      # conv  16 -> 8   : (bm, 512)
    h = leaky_bf16(dense(h, t2, b2))      # conv   8 -> 4   : (bm, 256)
    y = dense(h, t3, b3)                  # merged to_1x1   : (bm, 256) = [mu | log_std]
    mu = y[:, :LANE]                      # free 128-lane split (lanes >= 4 are 0)
    std = jnp.exp(y[:, LANE:])            # EUP; padded lanes -> exp(0) = 1
    z = mu + std * eps_ref[...].astype(jnp.float32)   # rsample; padded eps lanes 0 -> z lanes>=4 == 0
    h = leaky_bf16(dense(z, t4, b4))      # convT  1 -> 4   : (bm, 256)
    h = leaky_bf16(dense(h, t5, b5))      # convT  4 -> 8   : (bm, 512)
    xrec_ref[...] = dense(h, t6, b6).astype(xrec_ref.dtype)   # convT 8 -> 16, no out act
    mustd_ref[:, :LANE] = mu              # single packed latent output stream
    mustd_ref[:, LANE:] = std


# ------------------------------ forward wrapper -------------------------------
def vae_conv_forward(packed, x, eps):
    N = x.shape[0]
    feat_in = IN_CH * IMG * IMG
    feat_out = IN_CH * IMG * IMG
    zp = LANE

    rows = _round_up(N, SUBLANE)
    if rows >= 512:
        # enough work to engage both v7x TensorCores: force >= 2 grid steps on the
        # "parallel" axis instead of collapsing everything into one max-size tile
        block_m = min(BLOCK_M_MAX, _round_up(pl.cdiv(rows, 2), SUBLANE))
    else:
        block_m = min(rows, BLOCK_M_MAX)
    mp = _round_up(rows, block_m)
    grid = (mp // block_m,)

    # channel-last flatten at the module boundary only (C=1 so this is just HW);
    # activations cross HBM in bf16 (the kernel casts to bf16 before every dot anyway)
    x_flat = x.transpose(0, 2, 3, 1).reshape(N, feat_in).astype(jnp.bfloat16)
    x_flat = jnp.pad(x_flat, ((0, mp - N), (0, 0)))
    eps_p = jnp.pad(eps.reshape(N, Z_DIM).astype(jnp.bfloat16),
                    ((0, mp - N), (0, zp - Z_DIM)))

    def row_spec(cols):
        return pl.BlockSpec((block_m, cols), lambda i: (i, 0))

    def resident_spec(a):
        # weights/biases: constant block index -> VMEM-resident, not re-DMA'd per step
        return pl.BlockSpec(a.shape, lambda i: (0, 0))

    in_specs = [row_spec(feat_in), row_spec(zp)] + [resident_spec(a) for a in packed]
    out_specs = (row_spec(feat_out), row_spec(2 * zp))

    weight_bytes = sum(int(a.size) * int(a.dtype.itemsize) for a in packed)
    flops = 2 * mp * sum(int(t.shape[0]) * int(t.shape[1]) for t in packed[0::2])
    cost = pl.CostEstimate(
        flops=flops,
        transcendentals=mp * zp,
        bytes_accessed=(weight_bytes
                        + 2 * mp * (feat_in + zp + feat_out)   # bf16 x, eps, x_rec
                        + 4 * mp * (2 * zp)))                  # f32 packed [mu | std]

    xrec_p, mustd_p = pl.pallas_call(
        _vae_fused_kernel,
        out_shape=(jax.ShapeDtypeStruct((mp, feat_out), jnp.bfloat16),
                   jax.ShapeDtypeStruct((mp, 2 * zp), jnp.float32)),
        grid=grid,
        in_specs=in_specs,
        out_specs=out_specs,
        compiler_params=pltpu.CompilerParams(
            dimension_semantics=("parallel",),
            vmem_limit_bytes=VMEM_LIMIT),
        cost_estimate=cost,
    )(x_flat, eps_p, *packed)

    # module-facing outputs stay f32 (large-batch consumers can keep the bf16 x_rec)
    x_rec = xrec_p[:N].astype(jnp.float32).reshape(N, IMG, IMG, IN_CH).transpose(0, 3, 1, 2)
    mu = mustd_p[:N, :Z_DIM].reshape(N, Z_DIM, 1, 1)
    std = mustd_p[:N, zp:zp + Z_DIM].reshape(N, Z_DIM, 1, 1)
    return x_rec, mu, std


# ----------------------- plain-XLA reference (validation) ---------------------
def reference_forward(p, x, eps):
    def leaky(a):
        return jnp.where(a >= 0, a, LEAKY * a)

    def addb(y, b):
        return y + b[None, :, None, None]

    h = leaky(addb(_conv_op(p["e1_w"], 2, 1)(x), p["e1_b"]))
    h = leaky(addb(_conv_op(p["e2_w"], 2, 1)(h), p["e2_b"]))
    enc = addb(_conv_op(p["ez_w"], 1, 0)(h), p["ez_b"])
    mu, log_std = enc[:, :Z_DIM], enc[:, Z_DIM:]
    std = jnp.exp(log_std)
    z = mu + std * eps
    h = leaky(addb(_conv_transpose_op(p["d1_w"], 1, 0, 0)(z), p["d1_b"]))
    h = leaky(addb(_conv_transpose_op(p["d2_w"], 2, 1, 1)(h), p["d2_b"]))
    x_rec = addb(_conv_transpose_op(p["d3_w"], 2, 1, 1)(h), p["d3_b"])
    return x_rec, mu, std


# ----------------------------- parameters -----------------------------------
def init_params(key):
    ks = jax.random.split(key, 12)

    def w(k, shape, fan_in):
        return jax.random.normal(k, shape, jnp.float32) / jnp.sqrt(float(fan_in))

    def b(k, n):
        return 0.1 * jax.random.normal(k, (n,), jnp.float32)

    return {
        "e1_w": w(ks[0], (H_SIZE[0], IN_CH, 3, 3), IN_CH * 9),          "e1_b": b(ks[1], H_SIZE[0]),
        "e2_w": w(ks[2], (H_SIZE[1], H_SIZE[0], 3, 3), H_SIZE[0] * 9),  "e2_b": b(ks[3], H_SIZE[1]),
        "ez_w": w(ks[4], (2 * Z_DIM, H_SIZE[1], 4, 4), H_SIZE[1] * 16), "ez_b": b(ks[5], 2 * Z_DIM),
        "d1_w": w(ks[6], (Z_DIM, H_SIZE[1], 4, 4), Z_DIM * 16),         "d1_b": b(ks[7], H_SIZE[1]),
        "d2_w": w(ks[8], (H_SIZE[1], H_SIZE[0], 3, 3), H_SIZE[1] * 9),  "d2_b": b(ks[9], H_SIZE[0]),
        "d3_w": w(ks[10], (H_SIZE[0], IN_CH, 3, 3), H_SIZE[0] * 9),     "d3_b": b(ks[11], IN_CH),
    }


# ---------------------------------- main --------------------------------------
if __name__ == "__main__":
    key = jax.random.PRNGKey(0)
    kx, keps = jax.random.split(key, 2)
    x = jax.random.normal(kx, (2, IN_CH, IMG, IMG), jnp.float32)
    eps = jax.random.normal(keps, (2, Z_DIM, 1, 1), jnp.float32)  # deterministic rsample noise

    params = init_params(jax.random.PRNGKey(42))
    packed = pack_params(params)            # one-time weight repacking (off the hot path)

    fwd = jax.jit(vae_conv_forward)
    x_rec, mu, std = fwd(packed, x, eps)
    jax.block_until_ready((x_rec, mu, std))

    assert x_rec.shape == (2, IN_CH, IMG, IMG), x_rec.shape
    assert mu.shape == (2, Z_DIM, 1, 1), mu.shape
    assert std.shape == (2, Z_DIM, 1, 1), std.shape
    assert bool(jnp.all(jnp.isfinite(x_rec)))
    assert bool(jnp.all(jnp.isfinite(mu)))
    assert bool(jnp.all(std > 0))

    # numerical check vs the plain-XLA f32 conv reference (bf16 weights / activations
    # in the kernel -> loose but structural-bug-catching tolerance)
    ref_rec, ref_mu, ref_std = jax.jit(reference_forward)(params, x, eps)
    jax.block_until_ready((ref_rec, ref_mu, ref_std))

    def _check(a, b):
        tol = 0.1 * (1.0 + float(jnp.max(jnp.abs(b))))
        assert float(jnp.max(jnp.abs(a - b))) < tol, (float(jnp.max(jnp.abs(a - b))), tol)

    _check(x_rec, ref_rec)
    _check(mu, ref_mu)
    _check(std, ref_std)

    print("KERNEL_OK")
</pallas_src>

<mosaic_0001>
module attributes {stable_mosaic.version = 11 : i64} {
  func.func @_vae_fused_kernel(%arg0: i32, %arg1: memref<8x256xbf16, #tpu.memory_space<vmem>>, %arg2: memref<8x128xbf16, #tpu.memory_space<vmem>>, %arg3: memref<256x512xbf16, #tpu.memory_space<vmem>>, %arg4: memref<1x512xf32, #tpu.memory_space<vmem>>, %arg5: memref<512x256xbf16, #tpu.memory_space<vmem>>, %arg6: memref<1x256xf32, #tpu.memory_space<vmem>>, %arg7: memref<256x256xbf16, #tpu.memory_space<vmem>>, %arg8: memref<1x256xf32, #tpu.memory_space<vmem>>, %arg9: memref<128x256xbf16, #tpu.memory_space<vmem>>, %arg10: memref<1x256xf32, #tpu.memory_space<vmem>>, %arg11: memref<256x512xbf16, #tpu.memory_space<vmem>>, %arg12: memref<1x512xf32, #tpu.memory_space<vmem>>, %arg13: memref<512x256xbf16, #tpu.memory_space<vmem>>, %arg14: memref<1x256xf32, #tpu.memory_space<vmem>>, %arg15: memref<8x256xbf16, #tpu.memory_space<vmem>>, %arg16: memref<8x256xf32, #tpu.memory_space<vmem>>) attributes {dimension_semantics = [#tpu.dimension_semantics<parallel>], iteration_bounds = array<i64: 1>, scalar_prefetch = 0 : i64, scratch_operands = 0 : i64, tpu.core_type = #tpu.core_type<tc>, window_params = [{transform_indices = @transform_0, window_bounds = array<i64: 8, 256>}, {transform_indices = @transform_1, window_bounds = array<i64: 8, 128>}, {pipeline_mode = #tpu.pipeline_mode<synchronous>, transform_indices = @transform_2, window_bounds = array<i64: 256, 512>}, {pipeline_mode = #tpu.pipeline_mode<synchronous>, transform_indices = @transform_3, window_bounds = array<i64: 1, 512>}, {pipeline_mode = #tpu.pipeline_mode<synchronous>, transform_indices = @transform_4, window_bounds = array<i64: 512, 256>}, {pipeline_mode = #tpu.pipeline_mode<synchronous>, transform_indices = @transform_5, window_bounds = array<i64: 1, 256>}, {pipeline_mode = #tpu.pipeline_mode<synchronous>, transform_indices = @transform_6, window_bounds = array<i64: 256, 256>}, {pipeline_mode = #tpu.pipeline_mode<synchronous>, transform_indices = @transform_7, window_bounds = array<i64: 1, 256>}, {pipeline_mode = #tpu.pipeline_mode<synchronous>, transform_indices = @transform_8, window_bounds = array<i64: 128, 256>}, {pipeline_mode = #tpu.pipeline_mode<synchronous>, transform_indices = @transform_9, window_bounds = array<i64: 1, 256>}, {pipeline_mode = #tpu.pipeline_mode<synchronous>, transform_indices = @transform_10, window_bounds = array<i64: 256, 512>}, {pipeline_mode = #tpu.pipeline_mode<synchronous>, transform_indices = @transform_11, window_bounds = array<i64: 1, 512>}, {pipeline_mode = #tpu.pipeline_mode<synchronous>, transform_indices = @transform_12, window_bounds = array<i64: 512, 256>}, {pipeline_mode = #tpu.pipeline_mode<synchronous>, transform_indices = @transform_13, window_bounds = array<i64: 1, 256>}, {transform_indices = @transform_14, window_bounds = array<i64: 8, 256>}, {transform_indices = @transform_15, window_bounds = array<i64: 8, 256>}]} {
    %c0 = arith.constant 0 : index
    %c0_0 = arith.constant 0 : index
    %0 = vector.load %arg1[%c0, %c0_0] : memref<8x256xbf16, #tpu.memory_space<vmem>>, vector<8x256xbf16>
    %c0_1 = arith.constant 0 : index
    %c0_2 = arith.constant 0 : index
    %1 = vector.load %arg3[%c0_1, %c0_2] : memref<256x512xbf16, #tpu.memory_space<vmem>>, vector<256x512xbf16>
    %cst = arith.constant dense<0.000000e+00> : vector<8x512xf32>
    %2 = tpu.matmul %0, %1, %cst {dimension_numbers = #tpu.dot_dimension_numbers<[1], [0], [0], [1], [0, 0, 1, 1], [], []>} : vector<8x256xbf16>, vector<256x512xbf16>, vector<8x512xf32> -> vector<8x512xf32>
    %c0_3 = arith.constant 0 : index
    %c0_4 = arith.constant 0 : index
    %3 = vector.load %arg4[%c0_3, %c0_4] : memref<1x512xf32, #tpu.memory_space<vmem>>, vector<1x512xf32>
    %4 = vector.broadcast %3 : vector<1x512xf32> to vector<8x512xf32>
    %5 = arith.addf %2, %4 : vector<8x512xf32>
    %cst_5 = arith.constant 0.00999999977 : f32
    %6 = vector.broadcast %cst_5 : f32 to vector<8x512xf32>
    %7 = arith.mulf %6, %5 : vector<8x512xf32>
    %8 = arith.maximumf %5, %7 : vector<8x512xf32>
    %9 = arith.truncf %8 : vector<8x512xf32> to vector<8x512xbf16>
    %c0_6 = arith.constant 0 : index
    %c0_7 = arith.constant 0 : index
    %10 = vector.load %arg5[%c0_6, %c0_7] : memref<512x256xbf16, #tpu.memory_space<vmem>>, vector<512x256xbf16>
    %cst_8 = arith.constant dense<0.000000e+00> : vector<8x256xf32>
    %11 = tpu.matmul %9, %10, %cst_8 {dimension_numbers = #tpu.dot_dimension_numbers<[1], [0], [0], [1], [0, 0, 1, 1], [], []>} : vector<8x512xbf16>, vector<512x256xbf16>, vector<8x256xf32> -> vector<8x256xf32>
    %c0_9 = arith.constant 0 : index
    %c0_10 = arith.constant 0 : index
    %12 = vector.load %arg6[%c0_9, %c0_10] : memref<1x256xf32, #tpu.memory_space<vmem>>, vector<1x256xf32>
    %13 = vector.broadcast %12 : vector<1x256xf32> to vector<8x256xf32>
    %14 = arith.addf %11, %13 : vector<8x256xf32>
    %cst_11 = arith.constant 0.00999999977 : f32
    %15 = vector.broadcast %cst_11 : f32 to vector<8x256xf32>
    %16 = arith.mulf %15, %14 : vector<8x256xf32>
    %17 = arith.maximumf %14, %16 : vector<8x256xf32>
    %18 = arith.truncf %17 : vector<8x256xf32> to vector<8x256xbf16>
    %c0_12 = arith.constant 0 : index
    %c0_13 = arith.constant 0 : index
    %19 = vector.load %arg7[%c0_12, %c0_13] : memref<256x256xbf16, #tpu.memory_space<vmem>>, vector<256x256xbf16>
    %cst_14 = arith.constant dense<0.000000e+00> : vector<8x256xf32>
    %20 = tpu.matmul %18, %19, %cst_14 {dimension_numbers = #tpu.dot_dimension_numbers<[1], [0], [0], [1], [0, 0, 1, 1], [], []>} : vector<8x256xbf16>, vector<256x256xbf16>, vector<8x256xf32> -> vector<8x256xf32>
    %c0_15 = arith.constant 0 : index
    %c0_16 = arith.constant 0 : index
    %21 = vector.load %arg8[%c0_15, %c0_16] : memref<1x256xf32, #tpu.memory_space<vmem>>, vector<1x256xf32>
    %22 = vector.broadcast %21 : vector<1x256xf32> to vector<8x256xf32>
    %23 = arith.addf %20, %22 : vector<8x256xf32>
    %24 = vector.extract_strided_slice %23 {offsets = [0, 0], sizes = [8, 128], strides = [1, 1]} : vector<8x256xf32> to vector<8x128xf32>
    %25 = vector.extract_strided_slice %23 {offsets = [0, 128], sizes = [8, 128], strides = [1, 1]} : vector<8x256xf32> to vector<8x128xf32>
    %26 = math.exp %25 : vector<8x128xf32>
    %c0_17 = arith.constant 0 : index
    %c0_18 = arith.constant 0 : index
    %27 = vector.load %arg2[%c0_17, %c0_18] : memref<8x128xbf16, #tpu.memory_space<vmem>>, vector<8x128xbf16>
    %28 = arith.extf %27 : vector<8x128xbf16> to vector<8x128xf32>
    %29 = arith.mulf %26, %28 : vector<8x128xf32>
    %30 = arith.addf %24, %29 : vector<8x128xf32>
    %31 = arith.truncf %30 : vector<8x128xf32> to vector<8x128xbf16>
    %c0_19 = arith.constant 0 : index
    %c0_20 = arith.constant 0 : index
    %32 = vector.load %arg9[%c0_19, %c0_20] : memref<128x256xbf16, #tpu.memory_space<vmem>>, vector<128x256xbf16>
    %cst_21 = arith.constant dense<0.000000e+00> : vector<8x256xf32>
    %33 = tpu.matmul %31, %32, %cst_21 {dimension_numbers = #tpu.dot_dimension_numbers<[1], [0], [0], [1], [0, 0, 1, 1], [], []>} : vector<8x128xbf16>, vector<128x256xbf16>, vector<8x256xf32> -> vector<8x256xf32>
    %c0_22 = arith.constant 0 : index
    %c0_23 = arith.constant 0 : index
    %34 = vector.load %arg10[%c0_22, %c0_23] : memref<1x256xf32, #tpu.memory_space<vmem>>, vector<1x256xf32>
    %35 = vector.broadcast %34 : vector<1x256xf32> to vector<8x256xf32>
    %36 = arith.addf %33, %35 : vector<8x256xf32>
    %cst_24 = arith.constant 0.00999999977 : f32
    %37 = vector.broadcast %cst_24 : f32 to vector<8x256xf32>
    %38 = arith.mulf %37, %36 : vector<8x256xf32>
    %39 = arith.maximumf %36, %38 : vector<8x256xf32>
    %40 = arith.truncf %39 : vector<8x256xf32> to vector<8x256xbf16>
    %c0_25 = arith.constant 0 : index
    %c0_26 = arith.constant 0 : index
    %41 = vector.load %arg11[%c0_25, %c0_26] : memref<256x512xbf16, #tpu.memory_space<vmem>>, vector<256x512xbf16>
    %cst_27 = arith.constant dense<0.000000e+00> : vector<8x512xf32>
    %42 = tpu.matmul %40, %41, %cst_27 {dimension_numbers = #tpu.dot_dimension_numbers<[1], [0], [0], [1], [0, 0, 1, 1], [], []>} : vector<8x256xbf16>, vector<256x512xbf16>, vector<8x512xf32> -> vector<8x512xf32>
    %c0_28 = arith.constant 0 : index
    %c0_29 = arith.constant 0 : index
    %43 = vector.load %arg12[%c0_28, %c0_29] : memref<1x512xf32, #tpu.memory_space<vmem>>, vector<1x512xf32>
    %44 = vector.broadcast %43 : vector<1x512xf32> to vector<8x512xf32>
    %45 = arith.addf %42, %44 : vector<8x512xf32>
    %cst_30 = arith.constant 0.00999999977 : f32
    %46 = vector.broadcast %cst_30 : f32 to vector<8x512xf32>
    %47 = arith.mulf %46, %45 : vector<8x512xf32>
    %48 = arith.maximumf %45, %47 : vector<8x512xf32>
    %49 = arith.truncf %48 : vector<8x512xf32> to vector<8x512xbf16>
    %c0_31 = arith.constant 0 : index
    %c0_32 = arith.constant 0 : index
    %50 = vector.load %arg13[%c0_31, %c0_32] : memref<512x256xbf16, #tpu.memory_space<vmem>>, vector<512x256xbf16>
    %cst_33 = arith.constant dense<0.000000e+00> : vector<8x256xf32>
    %51 = tpu.matmul %49, %50, %cst_33 {dimension_numbers = #tpu.dot_dimension_numbers<[1], [0], [0], [1], [0, 0, 1, 1], [], []>} : vector<8x512xbf16>, vector<512x256xbf16>, vector<8x256xf32> -> vector<8x256xf32>
    %c0_34 = arith.constant 0 : index
    %c0_35 = arith.constant 0 : index
    %52 = vector.load %arg14[%c0_34, %c0_35] : memref<1x256xf32, #tpu.memory_space<vmem>>, vector<1x256xf32>
    %53 = vector.broadcast %52 : vector<1x256xf32> to vector<8x256xf32>
    %54 = arith.addf %51, %53 : vector<8x256xf32>
    %55 = arith.truncf %54 : vector<8x256xf32> to vector<8x256xbf16>
    %c0_36 = arith.constant 0 : index
    %c0_37 = arith.constant 0 : index
    %56 = vector.load %arg15[%c0_36, %c0_37] : memref<8x256xbf16, #tpu.memory_space<vmem>>, vector<8x256xbf16>
    tpu.vector_store %arg15[%c0_36, %c0_37], %55 {strides = array<i32>} : memref<8x256xbf16, #tpu.memory_space<vmem>>, vector<8x256xbf16>,
    %c0_38 = arith.constant 0 : index
    %c0_39 = arith.constant 0 : index
    %57 = vector.load %arg16[%c0_38, %c0_39] : memref<8x256xf32, #tpu.memory_space<vmem>>, vector<8x128xf32>
    tpu.vector_store %arg16[%c0_38, %c0_39], %24 {strides = array<i32>} : memref<8x256xf32, #tpu.memory_space<vmem>>, vector<8x128xf32>,
    %c0_40 = arith.constant 0 : index
    %c128 = arith.constant 128 : index
    %58 = vector.load %arg16[%c0_40, %c128] : memref<8x256xf32, #tpu.memory_space<vmem>>, vector<8x128xf32>
    tpu.vector_store %arg16[%c0_40, %c128], %26 {strides = array<i32>} : memref<8x256xf32, #tpu.memory_space<vmem>>, vector<8x128xf32>,
    return
  }
  func.func @transform_0(%arg0: i32) -> (i32, i32) {
    %c0_i32 = arith.constant 0 : i32
    %c0_i32_0 = arith.constant 0 : i32
    return %arg0, %c0_i32 : i32, i32
  }
  func.func @transform_1(%arg0: i32) -> (i32, i32) {
    %c0_i32 = arith.constant 0 : i32
    %c0_i32_0 = arith.constant 0 : i32
    return %arg0, %c0_i32 : i32, i32
  }
  func.func @transform_2(%arg0: i32) -> (i32, i32) {
    %c0_i32 = arith.constant 0 : i32
    %c0_i32_0 = arith.constant 0 : i32
    %c0_i32_1 = arith.constant 0 : i32
    return %c0_i32, %c0_i32_0 : i32, i32
  }
  func.func @transform_3(%arg0: i32) -> (i32, i32) {
    %c0_i32 = arith.constant 0 : i32
    %c0_i32_0 = arith.constant 0 : i32
    %c0_i32_1 = arith.constant 0 : i32
    return %c0_i32, %c0_i32_0 : i32, i32
  }
  func.func @transform_4(%arg0: i32) -> (i32, i32) {
    %c0_i32 = arith.constant 0 : i32
    %c0_i32_0 = arith.constant 0 : i32
    %c0_i32_1 = arith.constant 0 : i32
    return %c0_i32, %c0_i32_0 : i32, i32
  }
  func.func @transform_5(%arg0: i32) -> (i32, i32) {
    %c0_i32 = arith.constant 0 : i32
    %c0_i32_0 = arith.constant 0 : i32
    %c0_i32_1 = arith.constant 0 : i32
    return %c0_i32, %c0_i32_0 : i32, i32
  }
  func.func @transform_6(%arg0: i32) -> (i32, i32) {
    %c0_i32 = arith.constant 0 : i32
    %c0_i32_0 = arith.constant 0 : i32
    %c0_i32_1 = arith.constant 0 : i32
    return %c0_i32, %c0_i32_0 : i32, i32
  }
  func.func @transform_7(%arg0: i32) -> (i32, i32) {
    %c0_i32 = arith.constant 0 : i32
    %c0_i32_0 = arith.constant 0 : i32
    %c0_i32_1 = arith.constant 0 : i32
    return %c0_i32, %c0_i32_0 : i32, i32
  }
  func.func @transform_8(%arg0: i32) -> (i32, i32) {
    %c0_i32 = arith.constant 0 : i32
    %c0_i32_0 = arith.constant 0 : i32
    %c0_i32_1 = arith.constant 0 : i32
    return %c0_i32, %c0_i32_0 : i32, i32
  }
  func.func @transform_9(%arg0: i32) -> (i32, i32) {
    %c0_i32 = arith.constant 0 : i32
    %c0_i32_0 = arith.constant 0 : i32
    %c0_i32_1 = arith.constant 0 : i32
    return %c0_i32, %c0_i32_0 : i32, i32
  }
  func.func @transform_10(%arg0: i32) -> (i32, i32) {
    %c0_i32 = arith.constant 0 : i32
    %c0_i32_0 = arith.constant 0 : i32
    %c0_i32_1 = arith.constant 0 : i32
    return %c0_i32, %c0_i32_0 : i32, i32
  }
  func.func @transform_11(%arg0: i32) -> (i32, i32) {
    %c0_i32 = arith.constant 0 : i32
    %c0_i32_0 = arith.constant 0 : i32
    %c0_i32_1 = arith.constant 0 : i32
    return %c0_i32, %c0_i32_0 : i32, i32
  }
  func.func @transform_12(%arg0: i32) -> (i32, i32) {
    %c0_i32 = arith.constant 0 : i32
    %c0_i32_0 = arith.constant 0 : i32
    %c0_i32_1 = arith.constant 0 : i32
    return %c0_i32, %c0_i32_0 : i32, i32
  }
  func.func @transform_13(%arg0: i32) -> (i32, i32) {
    %c0_i32 = arith.constant 0 : i32
    %c0_i32_0 = arith.constant 0 : i32
    %c0_i32_1 = arith.constant 0 : i32
    return %c0_i32, %c0_i32_0 : i32, i32
  }
  func.func @transform_14(%arg0: i32) -> (i32, i32) {
    %c0_i32 = arith.constant 0 : i32
    %c0_i32_0 = arith.constant 0 : i32
    return %arg0, %c0_i32 : i32, i32
  }
  func.func @transform_15(%arg0: i32) -> (i32, i32) {
    %c0_i32 = arith.constant 0 : i32
    %c0_i32_0 = arith.constant 0 : i32
    return %arg0, %c0_i32 : i32, i32
  }
}

</mosaic_0001>

<bundles_post_ra>
// kernel: vae_conv_forward.1
= control target key start
LH: loop header
LB: loop body
LE: loop exit
PB: predicated region body
PF: predicated region fallthrough
CT: control target
= control target key end

     0   :  { %21 = vsyncpa [#allocation3], 0  ;;  %s4464_s0 = inlined_call_operand.vmem [shape: bf16[8,256], index: 0, kind: input, shape index: {}]   ;;  %s4465_s1 = inlined_call_operand.vmem [shape: bf16[8,128], index: 1, kind: input, shape index: {}]   ;;  %s4466_s2 = inlined_call_operand.hbm [shape: bf16[256,512], index: 2, kind: input, shape index: {}]   ;;  %s4467_s3 = inlined_call_operand.vmem [shape: f32[1,512], index: 3, kind: input, shape index: {}]   ;;  %s4468_s4 = inlined_call_operand.hbm [shape: bf16[512,256], index: 4, kind: input, shape index: {}]   ;;  %s4469_s5 = inlined_call_operand.vmem [shape: f32[1,256], index: 5, kind: input, shape index: {}]   ;;  %s4470_s6 = inlined_call_operand.hbm [shape: bf16[256,256], index: 6, kind: input, shape index: {}]   ;;  %s4471_s7 = inlined_call_operand.vmem [shape: f32[1,256], index: 7, kind: input, shape index: {}]   ;;  %s4472_s8 = inlined_call_operand.hbm [shape: bf16[128,256], index: 8, kind: input, shape index: {}]   ;;  %s4473_s9 = inlined_call_operand.vmem [shape: f32[1,256], index: 9, kind: input, shape index: {}]   ;;  %s4474_s10 = inlined_call_operand.hbm [shape: bf16[256,512], index: 10, kind: input, shape index: {}]   ;;  %s4475_s11 = inlined_call_operand.vmem [shape: f32[1,512], index: 11, kind: input, shape index: {}]   ;;  %s4476_s12 = inlined_call_operand.hbm [shape: bf16[512,256], index: 12, kind: input, shape index: {}]   ;;  %s4477_s13 = inlined_call_operand.vmem [shape: f32[1,256], index: 13, kind: input, shape index: {}]   ;;  %s4478_s14 = inlined_call_operand.vmem [shape: bf16[8,256], index: 14, kind: output, shape index: {0}]   ;;  %s4479_s15 = inlined_call_operand.vmem [shape: f32[8,256], index: 15, kind: output, shape index: {1}]  }
   0x1   :  { %22 = vsyncpa [#allocation5], 0 }
   0x2   :  { %23 = vsyncpa [#allocation8], 0  ;;  %s48_s20 = sshll.u32 %s4468_s4, 4  ;;  %s49_s20 = int_to_ptr.hbm [resolvable:$true] %s48_s20 }
   0x3   :  { %24 = vsyncpa [#allocation11], 0  ;;  %s4256_s21 = smov [#allocation4]   ;;  %s78_s25 = sshll.u32 %s4472_s8, 4  ;;  %s79_s25 = int_to_ptr.hbm [resolvable:$true] %s78_s25 }
   0x4   :  { %s50_s22 = sshll.u32 %s4256_s21, 4  ;;  %s4257_s26 = smov 128   ;;  %s51_s22 = int_to_ptr.vmem [resolvable:$true] %s50_s22 }
   0x5   :  { %s4258_s27 = smov 8   ;;  %s4259_s28 = smov [#allocation7]  }
   0x6   :  { %56 = dma.hbm_to_vmem [thread:$0]  %s49_s20, 8192, %s51_s22, [#allocation5], %s4257_s26, %s4257_s26, %s4258_s27  }
   0x7   :  { %s80_s29 = sshll.u32 %s4259_s28, 4  ;;  %s33_s16 = sshll.u32 %s4466_s2, 4  ;;  %s81_s29 = int_to_ptr.vmem [resolvable:$true] %s80_s29  ;;  %s34_s16 = int_to_ptr.hbm [resolvable:$true] %s33_s16 }
   0x8   :  { %86 = dma.hbm_to_vmem [thread:$0]  %s79_s25, 2048, %s81_s29, [#allocation8], %s4257_s26, %s4257_s26, %s4258_s27  }
   0x9   :  { %s4260_s8 = smov [#allocation2]   ;;  %s63_s20 = sshll.u32 %s4470_s6, 4  ;;  %s64_s20 = int_to_ptr.hbm [resolvable:$true] %s63_s20 }
   0xa   :  { %s35_s17 = sshll.u32 %s4260_s8, 4  ;;  %s4261_s21 = smov 256   ;;  %s36_s17 = int_to_ptr.vmem [resolvable:$true] %s35_s17 }
   0xb   :  { %s4262_s22 = smov 16   ;;  %s4263_s23 = smov [#allocation6]  }
   0xc   :  { %41 = dma.hbm_to_vmem [thread:$0]  %s34_s16, 8192, %s36_s17, [#allocation3], %s4261_s21, %s4261_s21, %s4262_s22  }
   0xd   :  { %s65_s24 = sshll.u32 %s4263_s23, 4  ;;  %s93_s30 = sshll.u32 %s4474_s10, 4  ;;  %s66_s24 = int_to_ptr.vmem [resolvable:$true] %s65_s24  ;;  %s94_s30 = int_to_ptr.hbm [resolvable:$true] %s93_s30 }
   0xe   :  { %71 = dma.hbm_to_vmem [thread:$0]  %s64_s20, 4096, %s66_s24, [#allocation5], %s4257_s26, %s4257_s26, %s4258_s27  }
   0xf   :  { %s108_s6 = sshll.u32 %s4476_s12, 4  ;;  %s4264_s4 = smov [#allocation9]   ;;  %s109_s6 = int_to_ptr.hbm [resolvable:$true] %s108_s6 }
  0x10   :  { %s95_s8 = sshll.u32 %s4264_s4, 4  ;;  %s4265_s16 = smov [#allocation10]   ;;  %s96_s8 = int_to_ptr.vmem [resolvable:$true] %s95_s8 }
  0x11   :  { %101 = dma.hbm_to_vmem [thread:$0]  %s94_s30, 8192, %s96_s8, [#allocation8], %s4261_s21, %s4261_s21, %s4262_s22  }
  0x12   :  { %s110_s17 = sshll.u32 %s4265_s16, 4  ;;  %s111_s17 = int_to_ptr.vmem [resolvable:$true] %s110_s17 }
  0x13   :  { %116 = dma.hbm_to_vmem [thread:$0]  %s109_s6, 8192, %s111_s17, [#allocation11], %s4257_s26, %s4257_s26, %s4258_s27  }
  0x14   :  { %4248 = dma.done.wait [#allocation3], 8192  }
  0x15   :  { %4249 = vsyncadd [#allocation3], 4294959104 }
  0x16   :  { %4250 = dma.done.wait [#allocation5], 12288  }
  0x17   :  { %4251 = vsyncadd [#allocation5], 4294955008 }
  0x18   :  { %4252 = dma.done.wait [#allocation8], 10240  }
  0x19   :  { %4253 = vsyncadd [#allocation8], 4294957056 }
  0x1a   :  { %4254 = dma.done.wait [#allocation11], 8192  }
  0x1b   :  { %4255 = vsyncadd [#allocation11], 4294959104  ;;  %v2686_v0 = vld [vmem:[#allocation2 + $0xe0] sm:$0xf]  ;;  %v3818_v1 = vld [vmem:[#allocation2 + $0xec] sm:$0xf0] }
  0x1c   :  { %v2814_v2 = vld [vmem:[#allocation2 + $0x1e0] sm:$0xf]  ;;  %v2687_v3 = vor.u32 %v3818_v1, %v2686_v0  ;;  %v3850_v4 = vld [vmem:[#allocation2 + $0x1ec] sm:$0xf0]  ;;  %v3816_v5 = vld [vmem:[#allocation2 + $0xe4] sm:$0xf] }
  0x1d   :  { %v2688_v6 = vld [vmem:[#allocation2 + $0xf0] sm:$0xf0]  ;;  %v2815_v7 = vor.u32 %v3850_v4, %v2814_v2  ;;  %v3848_v9 = vld [vmem:[#allocation2 + $0x1e4] sm:$0xf]  ;;  %v2670_v11 = vld [vmem:[#allocation2 + $0xc0] sm:$0xf] }
  0x1e   :  { %v2691_v8 = vor.u32 %v3816_v5, %v2688_v6  ;;  %v2816_v10 = vld [vmem:[#allocation2 + $0x1f0] sm:$0xf0]  ;;  %545 = vmatpush.bf16.msra.mxu0 %v2687_v3  ;;  %v3814_v13 = vld [vmem:[#allocation2 + $0xcc] sm:$0xf0]  ;;  %v2798_v14 = vld [vmem:[#allocation2 + $0x1c0] sm:$0xf] }
  0x1f   :  { %v2819_v12 = vor.u32 %v3848_v9, %v2816_v10  ;;  %v3846_v15 = vld [vmem:[#allocation2 + $0x1cc] sm:$0xf0]  ;;  %558 = vmatpush.bf16.msra.mxu1 %v2815_v7  ;;  %v2671_v16 = vor.u32 %v3814_v13, %v2670_v11  ;;  %v3812_v18 = vld [vmem:[#allocation2 + $0xc4] sm:$0xf]  ;;  %v2672_v19 = vld [vmem:[#allocation2 + $0xd0] sm:$0xf0] }
  0x20   :  { %571 = vmatpush.bf16.msra.mxu2 %v2691_v8  ;;  %v2799_v17 = vor.u32 %v3846_v15, %v2798_v14  ;;  %v3844_v20 = vld [vmem:[#allocation2 + $0x1c4] sm:$0xf]  ;;  %v2675_v21 = vor.u32 %v3812_v18, %v2672_v19  ;;  %v2800_v22 = vld [vmem:[#allocation2 + $0x1d0] sm:$0xf0]  ;;  %v2654_v23 = vld [vmem:[#allocation2 + $0xa0] sm:$0xf] }
  0x21   :  { %584 = vmatpush.bf16.msra.mxu3 %v2819_v12  ;;  %v3810_v24 = vld [vmem:[#allocation2 + $0xac] sm:$0xf0]  ;;  %v2803_v25 = vor.u32 %v3844_v20, %v2800_v22  ;;  %v2782_v26 = vld [vmem:[#allocation2 + $0x1a0] sm:$0xf]  ;;  %v3808_v28 = vld [vmem:[#allocation2 + $0xa4] sm:$0xf] }
  0x22   :  { %v3842_v27 = vld [vmem:[#allocation2 + $0x1ac] sm:$0xf0]  ;;  %546 = vmatpush.bf16.msra.mxu0 %v2671_v16  ;;  %v2655_v29 = vor.u32 %v3810_v24, %v2654_v23  ;;  %v2656_v30 = vld [vmem:[#allocation2 + $0xb0] sm:$0xf0]  ;;  %v3840_v31 = vld [vmem:[#allocation2 + $0x1a4] sm:$0xf] }
  0x23   :  { %v2784_v32 = vld [vmem:[#allocation2 + $0x1b0] sm:$0xf0]  ;;  %559 = vmatpush.bf16.msra.mxu1 %v2799_v17  ;;  %v2783_v33 = vor.u32 %v3842_v27, %v2782_v26  ;;  %v2659_v34 = vor.u32 %v3808_v28, %v2656_v30  ;;  %v2638_v35 = vld [vmem:[#allocation2 + $0x80] sm:$0xf]  ;;  %v3806_v36 = vld [vmem:[#allocation2 + $0x8c] sm:$0xf0] }
  0x24   :  { %572 = vmatpush.bf16.msra.mxu2 %v2675_v21  ;;  %v2766_v37 = vld [vmem:[#allocation2 + $0x180] sm:$0xf]  ;;  %v2787_v38 = vor.u32 %v3840_v31, %v2784_v32  ;;  %v3838_v39 = vld [vmem:[#allocation2 + $0x18c] sm:$0xf0]  ;;  %v3804_v40 = vld [vmem:[#allocation2 + $0x84] sm:$0xf]  ;;  %v2639_v44 = vor.u32 %v3806_v36, %v2638_v35 }
  0x25   :  { %585 = vmatpush.bf16.msra.mxu3 %v2803_v25  ;;  %v2640_v41 = vld [vmem:[#allocation2 + $0x90] sm:$0xf0]  ;;  %v3836_v42 = vld [vmem:[#allocation2 + $0x184] sm:$0xf]  ;;  %v2767_v45 = vor.u32 %v3838_v39, %v2766_v37  ;;  %v2622_v47 = vld [vmem:[#allocation2 + $0x60] sm:$0xf] }
  0x26   :  { %v2768_v43 = vld [vmem:[#allocation2 + $0x190] sm:$0xf0]  ;;  %547 = vmatpush.bf16.msra.mxu0 %v2655_v29  ;;  %v2643_v46 = vor.u32 %v3804_v40, %v2640_v41  ;;  %v3802_v48 = vld [vmem:[#allocation2 + $0x6c] sm:$0xf0]  ;;  %v2750_v49 = vld [vmem:[#allocation2 + $0x160] sm:$0xf] }
  0x27   :  { %560 = vmatpush.bf16.msra.mxu1 %v2783_v33  ;;  %v2771_v50 = vor.u32 %v3836_v42, %v2768_v43  ;;  %v3834_v51 = vld [vmem:[#allocation2 + $0x16c] sm:$0xf0]  ;;  %v3800_v52 = vld [vmem:[#allocation2 + $0x64] sm:$0xf]  ;;  %v2624_v53 = vld [vmem:[#allocation2 + $0x70] sm:$0xf0]  ;;  %v2623_v56 = vor.u32 %v3802_v48, %v2622_v47 }
  0x28   :  { %573 = vmatpush.bf16.msra.mxu2 %v2659_v34  ;;  %v3832_v54 = vld [vmem:[#allocation2 + $0x164] sm:$0xf]  ;;  %v2752_v55 = vld [vmem:[#allocation2 + $0x170] sm:$0xf0]  ;;  %v2751_v57 = vor.u32 %v3834_v51, %v2750_v49  ;;  %v2627_v58 = vor.u32 %v3800_v52, %v2624_v53  ;;  %v2606_v59 = vld [vmem:[#allocation2 + $0x40] sm:$0xf] }
  0x29   :  { %586 = vmatpush.bf16.msra.mxu3 %v2787_v38  ;;  %v3798_v60 = vld [vmem:[#allocation2 + $0x4c] sm:$0xf0]  ;;  %v2734_v61 = vld [vmem:[#allocation2 + $0x140] sm:$0xf]  ;;  %v2755_v62 = vor.u32 %v3832_v54, %v2752_v55  ;;  %v3796_v0 = vld [vmem:[#allocation2 + $0x44] sm:$0xf] }
  0x2a   :  { %548 = vmatpush.bf16.msra.mxu0 %v2639_v44  ;;  %v3830_v63 = vld [vmem:[#allocation2 + $0x14c] sm:$0xf0]  ;;  %v2608_v1 = vld [vmem:[#allocation2 + $0x50] sm:$0xf0]  ;;  %v3828_v2 = vld [vmem:[#allocation2 + $0x144] sm:$0xf]  ;;  %v2607_v4 = vor.u32 %v3798_v60, %v2606_v59 }
  0x2b   :  { %561 = vmatpush.bf16.msra.mxu1 %v2767_v45  ;;  %v2736_v3 = vld [vmem:[#allocation2 + $0x150] sm:$0xf0]  ;;  %v2735_v5 = vor.u32 %v3830_v63, %v2734_v61  ;;  %v2611_v6 = vor.u32 %v3796_v0, %v2608_v1  ;;  %v2590_v7 = vld [vmem:[#allocation2 + $0x20] sm:$0xf]  ;;  %v3794_v8 = vld [vmem:[#allocation2 + $0x2c] sm:$0xf0] }
  0x2c   :  { %574 = vmatpush.bf16.msra.mxu2 %v2643_v46  ;;  %v2718_v9 = vld [vmem:[#allocation2 + $0x120] sm:$0xf]  ;;  %v2739_v10 = vor.u32 %v3828_v2, %v2736_v3  ;;  %v3826_v11 = vld [vmem:[#allocation2 + $0x12c] sm:$0xf0]  ;;  %v3792_v12 = vld [vmem:[#allocation2 + $0x24] sm:$0xf]  ;;  %v2591_v16 = vor.u32 %v3794_v8, %v2590_v7 }
  0x2d   :  { %587 = vmatpush.bf16.msra.mxu3 %v2771_v50  ;;  %v2592_v13 = vld [vmem:[#allocation2 + $0x30] sm:$0xf0]  ;;  %v3824_v14 = vld [vmem:[#allocation2 + $0x124] sm:$0xf]  ;;  %v2574_v17 = vld [vmem:[#allocation2] sm:$0xf]  ;;  %v2719_v20 = vor.u32 %v3826_v11, %v2718_v9 }
  0x2e   :  { %549 = vmatpush.bf16.msra.mxu0 %v2623_v56  ;;  %v2720_v15 = vld [vmem:[#allocation2 + $0x130] sm:$0xf0]  ;;  %v3790_v18 = vld [vmem:[#allocation2 + $0xc] sm:$0xf0]  ;;  %v2702_v19 = vld [vmem:[#allocation2 + $0x100] sm:$0xf]  ;;  %v2595_v21 = vor.u32 %v3792_v12, %v2592_v13 }
  0x2f   :  { %562 = vmatpush.bf16.msra.mxu1 %v2751_v57  ;;  %v3822_v22 = vld [vmem:[#allocation2 + $0x10c] sm:$0xf0]  ;;  %v3788_v23 = vld [vmem:[#allocation2 + $0x4] sm:$0xf]  ;;  %v2723_v25 = vor.u32 %v3824_v14, %v2720_v15  ;;  %v2576_v26 = vld [vmem:[#allocation2 + $0x10] sm:$0xf0]  ;;  %v2575_v32 = vor.u32 %v3790_v18, %v2574_v17 }
  0x30   :  { %575 = vmatpush.bf16.msra.mxu2 %v2627_v58  ;;  %v143_v24 = vld [vmem:[%s4464_s0] sm:$0xff]  ;;  %v2704_v28 = vld [vmem:[#allocation2 + $0x110] sm:$0xf0]  ;;  %v2694_v29 = vld [vmem:[#allocation2 + $0xe8] sm:$0xf]  ;;  %v2703_v37 = vor.u32 %v3822_v22, %v2702_v19  ;;  %v2579_v38 = vor.u32 %v3788_v23, %v2576_v26 }
  0x31   :  { %588 = vmatpush.bf16.msra.mxu3 %v2755_v62  ;;  %v3820_v27 = vld [vmem:[#allocation2 + $0x104] sm:$0xf]  ;;  %v3819_v30 = vld [vmem:[#allocation2 + $0xf4] sm:$0xf0]  ;;  %v2822_v31 = vld [vmem:[#allocation2 + $0x1e8] sm:$0xf]  ;;  %v219_v36 = vunpack.c.l.b16 %v143_v24  ;;  %v220_v41 = vunpack.c.h.b16 %v143_v24 }
  0x32   :  { %550 = vmatpush.bf16.msra.mxu0 %v2607_v4  ;;  %v3851_v33 = vld [vmem:[#allocation2 + $0x1f4] sm:$0xf0]  ;;  %v3817_v34 = vld [vmem:[#allocation2 + $0xec] sm:$0xf]  ;;  %v2696_v35 = vld [vmem:[#allocation2 + $0xf8] sm:$0xf0]  ;;  %v2707_v42 = vor.u32 %v3820_v27, %v2704_v28  ;;  %v2695_v43 = vor.u32 %v3819_v30, %v2694_v29 }
  0x33   :  { %563 = vmatpush.bf16.msra.mxu1 %v2735_v5  ;;  %v3849_v39 = vld [vmem:[#allocation2 + $0x1ec] sm:$0xf]  ;;  %v2824_v40 = vld [vmem:[#allocation2 + $0x1f8] sm:$0xf0]  ;;  %v2823_v44 = vor.u32 %v3851_v33, %v2822_v31  ;;  %v2699_v45 = vor.u32 %v3817_v34, %v2696_v35  ;;  %v2678_v46 = vld [vmem:[#allocation2 + $0xc8] sm:$0xf]  ;;  %v4379_v50 = vpack.c.b16 %v219_v36, %v219_v36  ;;  %v4381_v54 = vpack.c.b16 %v220_v41, %v220_v41 }
  0x34   :  { %576 = vmatpush.bf16.msra.mxu2 %v2611_v6  ;;  %v3815_v47 = vld [vmem:[#allocation2 + $0xd4] sm:$0xf0]  ;;  %v2806_v48 = vld [vmem:[#allocation2 + $0x1c8] sm:$0xf]  ;;  %v2827_v49 = vor.u32 %v3849_v39, %v2824_v40  ;;  %v3813_v52 = vld [vmem:[#allocation2 + $0xcc] sm:$0xf] }
  0x35   :  { %589 = vmatpush.bf16.msra.mxu3 %v2739_v10  ;;  %v3847_v51 = vld [vmem:[#allocation2 + $0x1d4] sm:$0xf0]  ;;  %v2680_v53 = vld [vmem:[#allocation2 + $0xd8] sm:$0xf0]  ;;  %v3845_v55 = vld [vmem:[#allocation2 + $0x1cc] sm:$0xf]  ;;  %v2679_v57 = vor.u32 %v3815_v47, %v2678_v46 }
  0x36   :  { %551 = vmatpush.bf16.msra.mxu0 %v2591_v16  ;;  %v2808_v56 = vld [vmem:[#allocation2 + $0x1d8] sm:$0xf0]  ;;  %v2807_v58 = vor.u32 %v3847_v51, %v2806_v48  ;;  %v2683_v59 = vor.u32 %v3813_v52, %v2680_v53  ;;  %v2662_v60 = vld [vmem:[#allocation2 + $0xa8] sm:$0xf]  ;;  %v3811_v61 = vld [vmem:[#allocation2 + $0xb4] sm:$0xf0] }
  0x37   :  { %564 = vmatpush.bf16.msra.mxu1 %v2719_v20  ;;  %v2790_v62 = vld [vmem:[#allocation2 + $0x1a8] sm:$0xf]  ;;  %v2811_v63 = vor.u32 %v3845_v55, %v2808_v56  ;;  %v3843_v0 = vld [vmem:[#allocation2 + $0x1b4] sm:$0xf0]  ;;  %v3809_v1 = vld [vmem:[#allocation2 + $0xac] sm:$0xf]  ;;  %v2663_v5 = vor.u32 %v3811_v61, %v2662_v60 }
  0x38   :  { %577 = vmatpush.bf16.msra.mxu2 %v2595_v21  ;;  %v2664_v2 = vld [vmem:[#allocation2 + $0xb8] sm:$0xf0]  ;;  %v3841_v3 = vld [vmem:[#allocation2 + $0x1ac] sm:$0xf]  ;;  %v2791_v6 = vor.u32 %v3843_v0, %v2790_v62  ;;  %v2646_v8 = vld [vmem:[#allocation2 + $0x88] sm:$0xf] }
  0x39   :  { %590 = vmatpush.bf16.msra.mxu3 %v2723_v25  ;;  %v2792_v4 = vld [vmem:[#allocation2 + $0x1b8] sm:$0xf0]  ;;  %v2667_v7 = vor.u32 %v3809_v1, %v2664_v2  ;;  %v3807_v9 = vld [vmem:[#allocation2 + $0x94] sm:$0xf0]  ;;  %v2774_v10 = vld [vmem:[#allocation2 + $0x188] sm:$0xf] }
  0x3a   :  { %552 = vmatpush.bf16.msra.mxu0 %v2575_v32  ;;  %v2795_v11 = vor.u32 %v3841_v3, %v2792_v4  ;;  %v3839_v12 = vld [vmem:[#allocation2 + $0x194] sm:$0xf0]  ;;  %v3805_v13 = vld [vmem:[#allocation2 + $0x8c] sm:$0xf]  ;;  %v2648_v14 = vld [vmem:[#allocation2 + $0x98] sm:$0xf0]  ;;  %v2647_v17 = vor.u32 %v3807_v9, %v2646_v8 }
  0x3b   :  { %565 = vmatpush.bf16.msra.mxu1 %v2703_v37  ;;  %v3837_v15 = vld [vmem:[#allocation2 + $0x18c] sm:$0xf]  ;;  %v2776_v16 = vld [vmem:[#allocation2 + $0x198] sm:$0xf0]  ;;  %v2775_v18 = vor.u32 %v3839_v12, %v2774_v10  ;;  %v2651_v19 = vor.u32 %v3805_v13, %v2648_v14  ;;  %v2630_v20 = vld [vmem:[#allocation2 + $0x68] sm:$0xf] }
  0x3c   :  { %578 = vmatpush.bf16.msra.mxu2 %v2579_v38  ;;  %v3803_v21 = vld [vmem:[#allocation2 + $0x74] sm:$0xf0]  ;;  %v2758_v22 = vld [vmem:[#allocation2 + $0x168] sm:$0xf]  ;;  %v2779_v23 = vor.u32 %v3837_v15, %v2776_v16  ;;  %v3801_v25 = vld [vmem:[#allocation2 + $0x6c] sm:$0xf] }
  0x3d   :  { %591 = vmatpush.bf16.msra.mxu3 %v2707_v42  ;;  %553 = vmatmul.bf16.vlgmr.msra.gmra.mxu0 %v4379_v50  ;;  %v3835_v24 = vld [vmem:[#allocation2 + $0x174] sm:$0xf0]  ;;  %v2632_v26 = vld [vmem:[#allocation2 + $0x78] sm:$0xf0]  ;;  %v3833_v27 = vld [vmem:[#allocation2 + $0x16c] sm:$0xf]  ;;  %v2631_v29 = vor.u32 %v3803_v21, %v2630_v20 }
  0x3e   :  { %597 = vmatpush.bf16.msrb.mxu0 %v2695_v43  ;;  %566 = vmatmul.bf16.vlgmr.msra.gmra.mxu1 %v4381_v54  ;;  %v2760_v28 = vld [vmem:[#allocation2 + $0x178] sm:$0xf0]  ;;  %v2759_v30 = vor.u32 %v3835_v24, %v2758_v22  ;;  %v2635_v31 = vor.u32 %v3801_v25, %v2632_v26  ;;  %v2614_v32 = vld [vmem:[#allocation2 + $0x48] sm:$0xf]  ;;  %v3799_v33 = vld [vmem:[#allocation2 + $0x54] sm:$0xf0] }
  0x3f   :  { %610 = vmatpush.bf16.msrb.mxu1 %v2823_v44  ;;  %579 = vmatmul.bf16.vlgmr.msra.gmra.mxu2 %v4379_v50  ;;  %v2742_v34 = vld [vmem:[#allocation2 + $0x148] sm:$0xf]  ;;  %v2763_v35 = vor.u32 %v3833_v27, %v2760_v28  ;;  %v3831_v36 = vld [vmem:[#allocation2 + $0x154] sm:$0xf0]  ;;  %v3797_v37 = vld [vmem:[#allocation2 + $0x4c] sm:$0xf]  ;;  %v2615_v41 = vor.u32 %v3799_v33, %v2614_v32 }
  0x40   :  { %623 = vmatpush.bf16.msrb.mxu2 %v2699_v45  ;;  %592 = vmatmul.bf16.vlgmr.msra.gmra.mxu3 %v4381_v54  ;;  %v2616_v38 = vld [vmem:[#allocation2 + $0x58] sm:$0xf0]  ;;  %v3829_v39 = vld [vmem:[#allocation2 + $0x14c] sm:$0xf]  ;;  %v2743_v42 = vor.u32 %v3831_v36, %v2742_v34  ;;  %v2598_v44 = vld [vmem:[#allocation2 + $0x28] sm:$0xf] }
  0x41   :  { %636 = vmatpush.bf16.msrb.mxu3 %v2827_v49  ;;  %v2744_v40 = vld [vmem:[#allocation2 + $0x158] sm:$0xf0]  ;;  %v2619_v43 = vor.u32 %v3797_v37, %v2616_v38  ;;  %v3795_v45 = vld [vmem:[#allocation2 + $0x34] sm:$0xf0]  ;;  %v2726_v46 = vld [vmem:[#allocation2 + $0x128] sm:$0xf] }
  0x42   :  { %598 = vmatpush.bf16.msrb.mxu0 %v2679_v57  ;;  %v2747_v47 = vor.u32 %v3829_v39, %v2744_v40  ;;  %v3827_v48 = vld [vmem:[#allocation2 + $0x134] sm:$0xf0]  ;;  %v3793_v49 = vld [vmem:[#allocation2 + $0x2c] sm:$0xf]  ;;  %v2600_v51 = vld [vmem:[#allocation2 + $0x38] sm:$0xf0]  ;;  %v2599_v55 = vor.u32 %v3795_v45, %v2598_v44 }
  0x43   :  { %611 = vmatpush.bf16.msrb.mxu1 %v2807_v58  ;;  %v3825_v52 = vld [vmem:[#allocation2 + $0x12c] sm:$0xf]  ;;  %v2728_v53 = vld [vmem:[#allocation2 + $0x138] sm:$0xf0]  ;;  %v2582_v56 = vld [vmem:[#allocation2 + $0x8] sm:$0xf]  ;;  %v2727_v57 = vor.u32 %v3827_v48, %v2726_v46  ;;  %v2603_v58 = vor.u32 %v3793_v49, %v2600_v51 }
  0x44   :  { %624 = vmatpush.bf16.msrb.mxu2 %v2683_v59  ;;  %v3791_v59 = vld [vmem:[#allocation2 + $0x14] sm:$0xf0]  ;;  %v2710_v60 = vld [vmem:[#allocation2 + $0x108] sm:$0xf]  ;;  %v2731_v62 = vor.u32 %v3825_v52, %v2728_v53  ;;  %v2584_v0 = vld [vmem:[#allocation2 + $0x18] sm:$0xf0] }
  0x45   :  { %637 = vmatpush.bf16.msrb.mxu3 %v2811_v63  ;;  %v3823_v61 = vld [vmem:[#allocation2 + $0x114] sm:$0xf0]  ;;  %v3789_v63 = vld [vmem:[#allocation2 + $0xc] sm:$0xf]  ;;  %v2712_v2 = vld [vmem:[#allocation2 + $0x118] sm:$0xf0] }
  0x46   :  { %599 = vmatpush.bf16.msrb.mxu0 %v2663_v5  ;;  %v3821_v1 = vld [vmem:[#allocation2 + $0x10c] sm:$0xf]  ;;  %v2886_v3 = vld [vmem:[#allocation4 + $0x70] sm:$0xf]  ;;  %v3867_v4 = vld [vmem:[#allocation4 + $0x74] sm:$0xf0]  ;;  %v2583_v5 = vor.u32 %v3791_v59, %v2582_v56  ;;  %v2711_v8 = vor.u32 %v3823_v61, %v2710_v60  ;;  %v2587_v9 = vor.u32 %v3789_v63, %v2584_v0 }
  0x47   :  { %612 = vmatpush.bf16.msrb.mxu1 %v2791_v6  ;;  %v2950_v6 = vld [vmem:[#allocation4 + $0xf0] sm:$0xf]  ;;  %v2715_v10 = vor.u32 %v3821_v1, %v2712_v2  ;;  %v3899_v13 = vld [vmem:[#allocation4 + $0x174] sm:$0xf0]  ;;  %v2878_v14 = vld [vmem:[#allocation4 + $0x60] sm:$0xf] }
  0x48   :  { %625 = vmatpush.bf16.msrb.mxu2 %v2667_v7  ;;  %v3883_v7 = vld [vmem:[#allocation4 + $0xf4] sm:$0xf0]  ;;  %v3014_v12 = vld [vmem:[#allocation4 + $0x170] sm:$0xf]  ;;  %v3865_v15 = vld [vmem:[#allocation4 + $0x64] sm:$0xf0] }
  0x49   :  { %638 = vmatpush.bf16.msrb.mxu3 %v2795_v11  ;;  %v2887_v11 = vor.u32 %v3867_v4, %v2886_v3  ;;  %v2951_v16 = vor.u32 %v3883_v7, %v2950_v6  ;;  %v2879_v20 = vor.u32 %v3865_v15, %v2878_v14  ;;  %v2870_v21 = vld [vmem:[#allocation4 + $0x50] sm:$0xf]  ;;  %v3863_v22 = vld [vmem:[#allocation4 + $0x54] sm:$0xf0]  ;;  %v2862_v27 = vld [vmem:[#allocation4 + $0x40] sm:$0xf] }
  0x4a   :  { %600 = vmatpush.bf16.msrb.mxu0 %v2647_v17  ;;  %v2942_v17 = vld [vmem:[#allocation4 + $0xe0] sm:$0xf]  ;;  %v2934_v24 = vld [vmem:[#allocation4 + $0xd0] sm:$0xf]  ;;  %v3879_v25 = vld [vmem:[#allocation4 + $0xd4] sm:$0xf0]  ;;  %v2871_v26 = vor.u32 %v3863_v22, %v2870_v21 }
  0x4b   :  { %613 = vmatpush.bf16.msrb.mxu1 %v2775_v18  ;;  %v3881_v18 = vld [vmem:[#allocation4 + $0xe4] sm:$0xf0]  ;;  %v2854_v33 = vld [vmem:[#allocation4 + $0x30] sm:$0xf]  ;;  %v3859_v34 = vld [vmem:[#allocation4 + $0x34] sm:$0xf0] }
  0x4c   :  { %626 = vmatpush.bf16.msrb.mxu2 %v2651_v19  ;;  %v3015_v19 = vor.u32 %v3899_v13, %v3014_v12  ;;  %v3861_v28 = vld [vmem:[#allocation4 + $0x44] sm:$0xf0]  ;;  %v3875_v36 = vld [vmem:[#allocation4 + $0xb4] sm:$0xf0]  ;;  %v2855_v37 = vor.u32 %v3859_v34, %v2854_v33  ;;  %v2910_v40 = vld [vmem:[#allocation4 + $0xa0] sm:$0xf] }
  0x4d   :  { %639 = vmatpush.bf16.msrb.mxu3 %v2779_v23  ;;  %v2943_v23 = vor.u32 %v3881_v18, %v2942_v17  ;;  %v2863_v32 = vor.u32 %v3861_v28, %v2862_v27  ;;  %v3857_v38 = vld [vmem:[#allocation4 + $0x24] sm:$0xf0]  ;;  %v3855_v44 = vld [vmem:[#allocation4 + $0x14] sm:$0xf0]  ;;  %v2902_v46 = vld [vmem:[#allocation4 + $0x90] sm:$0xf] }
  0x4e   :  { %601 = vmatpush.bf16.msrb.mxu0 %v2631_v29  ;;  %v2935_v29 = vor.u32 %v3879_v25, %v2934_v24  ;;  %v2830_v49 = vld [vmem:[#allocation4] sm:$0xf]  ;;  %v3853_v51 = vld [vmem:[#allocation4 + $0x4] sm:$0xf0]  ;;  %v3866_v53 = vld [vmem:[#allocation4 + $0x74] sm:$0xf] }
  0x4f   :  { %614 = vmatpush.bf16.msrb.mxu1 %v2759_v30  ;;  %v2926_v30 = vld [vmem:[#allocation4 + $0xc0] sm:$0xf]  ;;  %v2831_v56 = vor.u32 %v3853_v51, %v2830_v49  ;;  %v3897_v59 = vld [vmem:[#allocation4 + $0x164] sm:$0xf0]  ;;  %v3864_v60 = vld [vmem:[#allocation4 + $0x64] sm:$0xf] }
  0x50   :  { %627 = vmatpush.bf16.msrb.mxu2 %v2635_v31  ;;  %v3877_v31 = vld [vmem:[#allocation4 + $0xc4] sm:$0xf0]  ;;  %v2894_v63 = vld [vmem:[#allocation4 + $0x80] sm:$0xf]  ;;  %v3078_v3 = vld [vmem:[#allocation4 + $0x1f0] sm:$0xf] }
  0x51   :  { %640 = vmatpush.bf16.msrb.mxu3 %v2763_v35  ;;  %v2927_v35 = vor.u32 %v3877_v31, %v2926_v30  ;;  %v3869_v0 = vld [vmem:[#allocation4 + $0x84] sm:$0xf0]  ;;  %v3915_v4 = vld [vmem:[#allocation4 + $0x1f4] sm:$0xf0]  ;;  %v2952_v7 = vld [vmem:[#allocation4 + $0xf8] sm:$0xf0] }
  0x52   :  { %602 = vmatpush.bf16.msrb.mxu0 %v2615_v41  ;;  %v3873_v41 = vld [vmem:[#allocation4 + $0xa4] sm:$0xf0]  ;;  %v2895_v2 = vor.u32 %v3869_v0, %v2894_v63  ;;  %v3079_v6 = vor.u32 %v3915_v4, %v3078_v3  ;;  %v2872_v13 = vld [vmem:[#allocation4 + $0x58] sm:$0xf0]  ;;  %v3070_v15 = vld [vmem:[#allocation4 + $0x1e0] sm:$0xf] }
  0x53   :  { %615 = vmatpush.bf16.msrb.mxu1 %v2743_v42  ;;  %v2911_v45 = vor.u32 %v3873_v41, %v2910_v40  ;;  %v3880_v17 = vld [vmem:[#allocation4 + $0xe4] sm:$0xf]  ;;  %v2990_v21 = vld [vmem:[#allocation4 + $0x140] sm:$0xf]  ;;  %v3893_v22 = vld [vmem:[#allocation4 + $0x144] sm:$0xf0] }
  0x54   :  { %628 = vmatpush.bf16.msrb.mxu2 %v2619_v43  ;;  %v2838_v43 = vld [vmem:[#allocation4 + $0x10] sm:$0xf]  ;;  %v3860_v24 = vld [vmem:[#allocation4 + $0x44] sm:$0xf]  ;;  %v2864_v25 = vld [vmem:[#allocation4 + $0x48] sm:$0xf0] }
  0x55   :  { %641 = vmatpush.bf16.msrb.mxu3 %v2747_v47  ;;  %v3871_v47 = vld [vmem:[#allocation4 + $0x94] sm:$0xf0]  ;;  %v2839_v48 = vor.u32 %v3855_v44, %v2838_v43  ;;  %v3062_v27 = vld [vmem:[#allocation4 + $0x1d0] sm:$0xf]  ;;  %v2936_v31 = vld [vmem:[#allocation4 + $0xd8] sm:$0xf0] }
  0x56   :  { %603 = vmatpush.bf16.msrb.mxu0 %v2599_v55  ;;  %v2903_v52 = vor.u32 %v3871_v47, %v2902_v46  ;;  %v2888_v55 = vld [vmem:[#allocation4 + $0x78] sm:$0xf0]  ;;  %v3911_v28 = vld [vmem:[#allocation4 + $0x1d4] sm:$0xf0]  ;;  %v2982_v33 = vld [vmem:[#allocation4 + $0x130] sm:$0xf] }
  0x57   :  { %616 = vmatpush.bf16.msrb.mxu1 %v2727_v57  ;;  %v2891_v57 = vor.u32 %v3866_v53, %v2888_v55  ;;  %v3063_v30 = vor.u32 %v3911_v28, %v3062_v27  ;;  %v3891_v34 = vld [vmem:[#allocation4 + $0x134] sm:$0xf0]  ;;  %v2928_v41 = vld [vmem:[#allocation4 + $0xc8] sm:$0xf0]  ;;  %v2974_v43 = vld [vmem:[#allocation4 + $0x120] sm:$0xf] }
  0x58   :  { %629 = vmatpush.bf16.msrb.mxu2 %v2603_v58  ;;  %v3006_v58 = vld [vmem:[#allocation4 + $0x160] sm:$0xf]  ;;  %v3889_v44 = vld [vmem:[#allocation4 + $0x124] sm:$0xf0]  ;;  %v2848_v47 = vld [vmem:[#allocation4 + $0x28] sm:$0xf0] }
  0x59   :  { %642 = vmatpush.bf16.msrb.mxu3 %v2731_v62  ;;  %v3007_v61 = vor.u32 %v3897_v59, %v3006_v58  ;;  %v2880_v62 = vld [vmem:[#allocation4 + $0x68] sm:$0xf0]  ;;  %v2975_v46 = vor.u32 %v3889_v44, %v2974_v43  ;;  %v3046_v49 = vld [vmem:[#allocation4 + $0x1b0] sm:$0xf]  ;;  %v3907_v51 = vld [vmem:[#allocation4 + $0x1b4] sm:$0xf0] }
  0x5a   :  { %604 = vmatpush.bf16.msrb.mxu0 %v2583_v5  ;;  %v2883_v1 = vor.u32 %v3864_v60, %v2880_v62  ;;  %v3882_v5 = vld [vmem:[#allocation4 + $0xf4] sm:$0xf]  ;;  %v3047_v53 = vor.u32 %v3907_v51, %v3046_v49  ;;  %v2920_v55 = vld [vmem:[#allocation4 + $0xb8] sm:$0xf0]  ;;  %v3038_v62 = vld [vmem:[#allocation4 + $0x1a0] sm:$0xf] }
  0x5b   :  { %617 = vmatpush.bf16.msrb.mxu1 %v2711_v8  ;;  %v2955_v8 = vor.u32 %v3882_v5, %v2952_v7  ;;  %v3854_v60 = vld [vmem:[#allocation4 + $0x14] sm:$0xf]  ;;  %v3905_v0 = vld [vmem:[#allocation4 + $0x1a4] sm:$0xf0]  ;;  %v2958_v5 = vld [vmem:[#allocation4 + $0x100] sm:$0xf] }
  0x5c   :  { %630 = vmatpush.bf16.msrb.mxu2 %v2587_v9  ;;  %v2998_v9 = vld [vmem:[#allocation4 + $0x150] sm:$0xf]  ;;  %v3039_v3 = vor.u32 %v3905_v0, %v3038_v62  ;;  %v3852_v7 = vld [vmem:[#allocation4 + $0x4] sm:$0xf]  ;;  %v2992_v44 = vld [vmem:[#allocation4 + $0x148] sm:$0xf0] }
  0x5d   :  { %643 = vmatpush.bf16.msrb.mxu3 %v2715_v10  ;;  %605 = vmatmul.bf16.vlgmr.msrb.gmra.mxu0 %v4379_v50  ;;  %v3895_v10 = vld [vmem:[#allocation4 + $0x154] sm:$0xf0]  ;;  %v3868_v27 = vld [vmem:[#allocation4 + $0x84] sm:$0xf]  ;;  %v3056_v0 = vld [vmem:[#allocation4 + $0x1c8] sm:$0xf0] }
  0x5e   :  { %1051 = vmatpush.bf16.msra.mxu0 %v2887_v11  ;;  %618 = vmatmul.bf16.vlgmr.msrb.gmra.mxu1 %v4381_v54  ;;  %v3862_v11 = vld [vmem:[#allocation4 + $0x54] sm:$0xf]  ;;  %v2999_v12 = vor.u32 %v3895_v10, %v2998_v9  ;;  %v2832_v9 = vld [vmem:[#allocation4 + $0x8] sm:$0xf0]  ;;  %v3892_v43 = vld [vmem:[#allocation4 + $0x144] sm:$0xf] }
  0x5f   :  { %1064 = vmatpush.bf16.msra.mxu1 %v2951_v16  ;;  %631 = vmatmul.bf16.vlgmr.msrb.gmra.mxu2 %v4379_v50  ;;  %v2918_v50 = vld [vmem:[#allocation4 + $0xb0] sm:$0xf]  ;;  %v2875_v14 = vor.u32 %v3862_v11, %v2872_v13  ;;  %v3913_v16 = vld [vmem:[#allocation4 + $0x1e4] sm:$0xf0]  ;;  %v3898_v10 = vld [vmem:[#allocation4 + $0x174] sm:$0xf] }
  0x60   :  { %644 = vmatmul.bf16.vlgmr.msrb.gmra.mxu3 %v4381_v54  ;;  %1077 = vmatpush.bf16.msra.mxu2 %v3015_v19  ;;  %v2846_v54 = vld [vmem:[#allocation4 + $0x20] sm:$0xf]  ;;  %v2919_v39 = vor.u32 %v3875_v36, %v2918_v50  ;;  %v3071_v18 = vor.u32 %v3913_v16, %v3070_v15  ;;  %v2944_v19 = vld [vmem:[#allocation4 + $0xe8] sm:$0xf0]  ;;  %v2983_v50 = vor.u32 %v3891_v34, %v2982_v33  ;;  %v2856_v36 = vld [vmem:[#allocation4 + $0x38] sm:$0xf0] }
  0x61   :  { %v2847_v42 = vor.u32 %v3857_v38, %v2846_v54  ;;  %1090 = vmatpush.bf16.msra.mxu3 %v3079_v6  ;;  %v3054_v54 = vld [vmem:[#allocation4 + $0x1c0] sm:$0xf]  ;;  %v3909_v38 = vld [vmem:[#allocation4 + $0x1c4] sm:$0xf0]  ;;  %v3016_v11 = vld [vmem:[#allocation4 + $0x178] sm:$0xf0] }
  0x62   :  { %1052 = vmatpush.bf16.msra.mxu0 %v2879_v20  ;;  %v2947_v20 = vor.u32 %v3880_v17, %v2944_v19  ;;  %v3055_v40 = vor.u32 %v3909_v38, %v3054_v54  ;;  %v3885_v6 = vld [vmem:[#allocation4 + $0x104] sm:$0xf0]  ;;  %v3019_v13 = vor.u32 %v3898_v10, %v3016_v11  ;;  %v3903_v15 = vld [vmem:[#allocation4 + $0x194] sm:$0xf0]  ;;  %v3870_v16 = vld [vmem:[#allocation4 + $0x94] sm:$0xf] }
  0x63   :  { %1065 = vmatpush.bf16.msra.mxu1 %v2943_v23  ;;  %v2991_v23 = vor.u32 %v3893_v22, %v2990_v21  ;;  %v4394_v19 = vld [vmem:[%s4467_s3] sm:$0xf]  ;;  %v3896_v22 = vld [vmem:[#allocation4 + $0x164] sm:$0xf]  ;;  %v3886_v11 = vld [vmem:[#allocation4 + $0x114] sm:$0xf] }
  0x64   :  { %1078 = vmatpush.bf16.msra.mxu2 %v3007_v61  ;;  %v2840_v61 = vld [vmem:[#allocation4 + $0x18] sm:$0xf0]  ;;  %v210_v21 = vperm.slane %v4394_v19, 0  ;;  %v3912_v38 = vld [vmem:[#allocation4 + $0x1e4] sm:$0xf] }
  0x65   :  { %1091 = vmatpush.bf16.msra.mxu3 %v3071_v18  ;;  %v2843_v63 = vor.u32 %v3854_v60, %v2840_v61  ;;  %v2904_v18 = vld [vmem:[#allocation4 + $0x98] sm:$0xf0] }
  0x66   :  { %1053 = vmatpush.bf16.msra.mxu0 %v2871_v26  ;;  %v2867_v26 = vor.u32 %v3860_v24, %v2864_v25  ;;  %v3022_v25 = vld [vmem:[#allocation4 + $0x180] sm:$0xf] }
  0x67   :  { %1066 = vmatpush.bf16.msra.mxu1 %v2935_v29  ;;  %v3878_v29 = vld [vmem:[#allocation4 + $0xd4] sm:$0xf] }
  0x68   :  { %1079 = vmatpush.bf16.msra.mxu2 %v2999_v12  ;;  %v2835_v12 = vor.u32 %v3852_v7, %v2832_v9  ;;  %v3906_v7 = vld [vmem:[#allocation4 + $0x1b4] sm:$0xf] }
  0x69   :  { %1092 = vmatpush.bf16.msra.mxu3 %v3063_v30  ;;  %v3914_v30 = vld [vmem:[#allocation4 + $0x1f4] sm:$0xf] }
  0x6a   :  { %1054 = vmatpush.bf16.msra.mxu0 %v2863_v32  ;;  %v2939_v32 = vor.u32 %v3878_v29, %v2936_v31  ;;  %v2896_v29 = vld [vmem:[#allocation4 + $0x88] sm:$0xf0]  ;;  %v3080_v31 = vld [vmem:[#allocation4 + $0x1f8] sm:$0xf0] }
  0x6b   :  { %1067 = vmatpush.bf16.msra.mxu1 %v2927_v35  ;;  %v3858_v35 = vld [vmem:[#allocation4 + $0x34] sm:$0xf]  ;;  %v3083_v33 = vor.u32 %v3914_v30, %v3080_v31 }
  0x6c   :  { %1080 = vmatpush.bf16.msra.mxu2 %v2991_v23  ;;  %v3008_v23 = vld [vmem:[#allocation4 + $0x168] sm:$0xf0] }
  0x6d   :  { %1093 = vmatpush.bf16.msra.mxu3 %v3055_v40  ;;  %v3011_v24 = vor.u32 %v3896_v22, %v3008_v23  ;;  %v3902_v22 = vld [vmem:[#allocation4 + $0x194] sm:$0xf]  ;;  %v3032_v23 = vld [vmem:[#allocation4 + $0x198] sm:$0xf0] }
  0x6e   :  { %1055 = vmatpush.bf16.msra.mxu0 %v2855_v37  ;;  %v2859_v37 = vor.u32 %v3858_v35, %v2856_v36  ;;  %v3894_v35 = vld [vmem:[#allocation4 + $0x154] sm:$0xf] }
  0x6f   :  { %1068 = vmatpush.bf16.msra.mxu1 %v2919_v39  ;;  %v3876_v39 = vld [vmem:[#allocation4 + $0xc4] sm:$0xf] }
  0x70   :  { %1081 = vmatpush.bf16.msra.mxu2 %v2983_v50  ;;  %v3000_v50 = vld [vmem:[#allocation4 + $0x158] sm:$0xf0] }
  0x71   :  { %1094 = vmatpush.bf16.msra.mxu3 %v3047_v53  ;;  %v3003_v54 = vor.u32 %v3894_v35, %v3000_v50 }
  0x72   :  { %1056 = vmatpush.bf16.msra.mxu0 %v2847_v42  ;;  %v2931_v42 = vor.u32 %v3876_v39, %v2928_v41  ;;  %v3072_v39 = vld [vmem:[#allocation4 + $0x1e8] sm:$0xf0] }
  0x73   :  { %1069 = vmatpush.bf16.msra.mxu1 %v2911_v45  ;;  %v3856_v45 = vld [vmem:[#allocation4 + $0x24] sm:$0xf]  ;;  %v3075_v41 = vor.u32 %v3912_v38, %v3072_v39 }
  0x74   :  { %1082 = vmatpush.bf16.msra.mxu2 %v2975_v46  ;;  %v2995_v46 = vor.u32 %v3892_v43, %v2992_v44 }
  0x75   :  { %1095 = vmatpush.bf16.msra.mxu3 %v3039_v3  ;;  %v3888_v3 = vld [vmem:[#allocation4 + $0x124] sm:$0xf] }
  0x76   :  { %1057 = vmatpush.bf16.msra.mxu0 %v2839_v48  ;;  %v2851_v48 = vor.u32 %v3856_v45, %v2848_v47  ;;  %v3910_v47 = vld [vmem:[#allocation4 + $0x1d4] sm:$0xf] }
  0x77   :  { %1070 = vmatpush.bf16.msra.mxu1 %v2903_v52  ;;  %v3874_v52 = vld [vmem:[#allocation4 + $0xb4] sm:$0xf] }
  0x78   :  { %v2923_v58 = vor.u32 %v3874_v52, %v2920_v55 }
  0x7a   :  { %1058 = vmatpush.bf16.msra.mxu0 %v2831_v56  ;;  %v2966_v56 = vld [vmem:[#allocation4 + $0x110] sm:$0xf] }
  0x7b   :  { %1071 = vmatpush.bf16.msra.mxu1 %v2895_v2  ;;  %v2912_v2 = vld [vmem:[#allocation4 + $0xa8] sm:$0xf0] }
  0x7e   :  { %1103 = vmatpush.bf16.msrb.mxu0 %v2891_v57  ;;  %v3887_v57 = vld [vmem:[#allocation4 + $0x114] sm:$0xf0] }
  0x7f   :  { %1116 = vmatpush.bf16.msrb.mxu1 %v2955_v8  ;;  %v2967_v59 = vor.u32 %v3887_v57, %v2966_v56  ;;  %v2959_v8 = vor.u32 %v3885_v6, %v2958_v5  ;;  %v3890_v57 = vld [vmem:[#allocation4 + $0x134] sm:$0xf] }
  0x81   :  { %1083 = vmatpush.bf16.msra.mxu2 %v2967_v59 }
  0x82   :  { %1104 = vmatpush.bf16.msrb.mxu0 %v2883_v1  ;;  %v3872_v1 = vld [vmem:[#allocation4 + $0xa4] sm:$0xf] }
  0x83   :  { %1117 = vmatpush.bf16.msrb.mxu1 %v2947_v20  ;;  %v2915_v4 = vor.u32 %v3872_v1, %v2912_v2  ;;  %v2907_v20 = vor.u32 %v3870_v16, %v2904_v18  ;;  %v3884_v18 = vld [vmem:[#allocation4 + $0x104] sm:$0xf] }
  0x85   :  { %1084 = vmatpush.bf16.msra.mxu2 %v2959_v8  ;;  %v3048_v8 = vld [vmem:[#allocation4 + $0x1b8] sm:$0xf0] }
  0x86   :  { %1105 = vmatpush.bf16.msrb.mxu0 %v2875_v14  ;;  %v3030_v14 = vld [vmem:[#allocation4 + $0x190] sm:$0xf]  ;;  %v3051_v10 = vor.u32 %v3906_v7, %v3048_v8 }
  0x87   :  { %1118 = vmatpush.bf16.msrb.mxu1 %v2939_v32  ;;  %v3031_v17 = vor.u32 %v3903_v15, %v3030_v14  ;;  %v2899_v32 = vor.u32 %v3868_v27, %v2896_v29  ;;  %v3024_v27 = vld [vmem:[#allocation4 + $0x188] sm:$0xf0]  ;;  %v212_v29 = vperm.slane %v4394_v19, 2 }
  0x89   :  { %1129 = vmatpush.bf16.msrb.mxu2 %v3019_v13  ;;  %1096 = vmatpush.bf16.msra.mxu3 %v3031_v17  ;;  %v3904_v13 = vld [vmem:[#allocation4 + $0x1a4] sm:$0xf]  ;;  %v3040_v17 = vld [vmem:[#allocation4 + $0x1a8] sm:$0xf0] }
  0x8a   :  { %1106 = vmatpush.bf16.msrb.mxu0 %v2867_v26  ;;  %v3901_v26 = vld [vmem:[#allocation4 + $0x184] sm:$0xf0] }
  0x8b   :  { %1119 = vmatpush.bf16.msrb.mxu1 %v2931_v42  ;;  %v3023_v28 = vor.u32 %v3901_v26, %v3022_v25  ;;  %v211_v42 = vperm.slane %v4394_v19, 1  ;;  %v3035_v25 = vor.u32 %v3902_v22, %v3032_v23  ;;  %v3900_v26 = vld [vmem:[#allocation4 + $0x184] sm:$0xf]  ;;  %v3921_v23 = vld [vmem:[#allocation6 + $0x24] sm:$0xf0] }
  0x8d   :  { %1130 = vmatpush.bf16.msrb.mxu2 %v3011_v24  ;;  %1097 = vmatpush.bf16.msra.mxu3 %v3023_v28  ;;  %v3027_v28 = vor.u32 %v3900_v26, %v3024_v27 }
  0x8e   :  { %1107 = vmatpush.bf16.msrb.mxu0 %v2859_v37 }
  0x8f   :  { %1120 = vmatpush.bf16.msrb.mxu1 %v2923_v58  ;;  %v2984_v58 = vld [vmem:[#allocation4 + $0x138] sm:$0xf0] }
  0x90   :  { %v2987_v61 = vor.u32 %v3890_v57, %v2984_v58  ;;  %v3136_v58 = vld [vmem:[#allocation6 + $0x68] sm:$0xf0] }
  0x91   :  { %1142 = vmatpush.bf16.msrb.mxu3 %v3083_v33  ;;  %1131 = vmatpush.bf16.msrb.mxu2 %v3003_v54 }
  0x92   :  { %1108 = vmatpush.bf16.msrb.mxu0 %v2851_v48  ;;  %v3064_v48 = vld [vmem:[#allocation4 + $0x1d8] sm:$0xf0] }
  0x93   :  { %1121 = vmatpush.bf16.msrb.mxu1 %v2915_v4  ;;  %v3067_v52 = vor.u32 %v3910_v47, %v3064_v48  ;;  %v2976_v4 = vld [vmem:[#allocation4 + $0x128] sm:$0xf0]  ;;  %v3931_v47 = vld [vmem:[#allocation6 + $0x74] sm:$0xf0]  ;;  %v3930_v48 = vld [vmem:[#allocation6 + $0x74] sm:$0xf] }
  0x94   :  { %v2979_v5 = vor.u32 %v3888_v3, %v2976_v4  ;;  %v3925_v3 = vld [vmem:[#allocation6 + $0x44] sm:$0xf0]  ;;  %v3924_v4 = vld [vmem:[#allocation6 + $0x44] sm:$0xf] }
  0x95   :  { %1143 = vmatpush.bf16.msrb.mxu3 %v3075_v41  ;;  %1132 = vmatpush.bf16.msrb.mxu2 %v2995_v46 }
  0x96   :  { %1109 = vmatpush.bf16.msrb.mxu0 %v2843_v63  ;;  %v3908_v63 = vld [vmem:[#allocation4 + $0x1c4] sm:$0xf] }
  0x97   :  { %1122 = vmatpush.bf16.msrb.mxu1 %v2907_v20  ;;  %v3059_v1 = vor.u32 %v3908_v63, %v3056_v0  ;;  %v2960_v20 = vld [vmem:[#allocation4 + $0x108] sm:$0xf0]  ;;  %v3128_v0 = vld [vmem:[#allocation6 + $0x58] sm:$0xf0] }
  0x98   :  { %v2963_v24 = vor.u32 %v3884_v18, %v2960_v20  ;;  %v3946_v18 = vld [vmem:[#allocation6 + $0xf4] sm:$0xf]  ;;  %v3208_v20 = vld [vmem:[#allocation6 + $0xf8] sm:$0xf0] }
  0x99   :  { %1144 = vmatpush.bf16.msrb.mxu3 %v3067_v52  ;;  %1133 = vmatpush.bf16.msrb.mxu2 %v2987_v61  ;;  %v3927_v61 = vld [vmem:[#allocation6 + $0x54] sm:$0xf0]  ;;  %v3211_v22 = vor.u32 %v3946_v18, %v3208_v20  ;;  %v3150_v20 = vld [vmem:[#allocation6 + $0x80] sm:$0xf] }
  0x9a   :  { %1110 = vmatpush.bf16.msrb.mxu0 %v2835_v12  ;;  %v2968_v12 = vld [vmem:[#allocation4 + $0x118] sm:$0xf0] }
  0x9b   :  { %1123 = vmatpush.bf16.msrb.mxu1 %v2899_v32  ;;  %v2971_v16 = vor.u32 %v3886_v11, %v2968_v12  ;;  %v3206_v11 = vld [vmem:[#allocation6 + $0xf0] sm:$0xf] }
  0x9d   :  { %1145 = vmatpush.bf16.msrb.mxu3 %v3059_v1  ;;  %1134 = vmatpush.bf16.msrb.mxu2 %v2979_v5 }
  0xa1   :  { %1146 = vmatpush.bf16.msrb.mxu3 %v3051_v10  ;;  %1135 = vmatpush.bf16.msrb.mxu2 %v2971_v16  ;;  %v3923_v10 = vld [vmem:[#allocation6 + $0x34] sm:$0xf0] }
  0xa5   :  { %1136 = vmatpush.bf16.msrb.mxu2 %v2963_v24  ;;  %v3198_v24 = vld [vmem:[#allocation6 + $0xe0] sm:$0xf] }
  0xba   :  { %v554_v34 = vpop.f32.mrf.mxu0 }
  0xbb   :  { %v555_v36 = vadd.f32 %v554_v34, %v210_v21  ;;  %v567_v37 = vpop.f32.mrf.mxu1  ;;  %v3043_v21 = vor.u32 %v3904_v13, %v3040_v17  ;;  %v213_v34 = vperm.slane %v4394_v19, 3  ;;  %v3142_v19 = vld [vmem:[#allocation6 + $0x70] sm:$0xf]  ;;  %v3947_v13 = vld [vmem:[#allocation6 + $0xf4] sm:$0xf0] }
  0xbc   :  { %v3207_v16 = vor.u32 %v3947_v13, %v3206_v11  ;;  %v3935_v13 = vld [vmem:[#allocation6 + $0x94] sm:$0xf0] }
  0xbd   :  { %v568_v40 = vadd.f32 %v567_v37, %v555_v36  ;;  %1147 = vmatpush.bf16.msrb.mxu3 %v3043_v21  ;;  %v3102_v21 = vld [vmem:[#allocation6 + $0x20] sm:$0xf] }
  0xbe   :  { %v3103_v26 = vor.u32 %v3921_v23, %v3102_v21  ;;  %v3933_v21 = vld [vmem:[#allocation6 + $0x84] sm:$0xf0] }
  0xbf   :  { %v649_v45 = vmul.f32 0.01, %v568_v40 }
  0xc1   :  { %v653_v49 = vmax.f32 %v568_v40, %v649_v45  ;;  %1148 = vmatpush.bf16.msrb.mxu3 %v3035_v25  ;;  %v3945_v25 = vld [vmem:[#allocation6 + $0xe4] sm:$0xf0] }
  0xc2   :  { %v580_v51 = vpop.f32.mrf.mxu2  ;;  %v556_v56 = vpop.f32.mrf.mxu0  ;;  %v3199_v27 = vor.u32 %v3945_v25, %v3198_v24  ;;  %v3151_v25 = vor.u32 %v3933_v21, %v3150_v20  ;;  %v3952_v20 = vld [vmem:[#allocation7 + $0x24] sm:$0xf]  ;;  %v3232_v21 = vld [vmem:[#allocation7 + $0x28] sm:$0xf0] }
  0xc3   :  { %v581_v53 = vadd.f32 %v580_v51, %v211_v42  ;;  %v593_v55 = vpop.f32.mrf.mxu3  ;;  %v657_v59 = vpack.c.bf16 %v653_v49, %v653_v49  ;;  %v569_v60 = vpop.f32.mrf.mxu1  ;;  %v3143_v49 = vor.u32 %v3931_v47, %v3142_v19  ;;  %v3144_v51 = vld [vmem:[#allocation6 + $0x78] sm:$0xf0]  ;;  %v3928_v56 = vld [vmem:[#allocation6 + $0x64] sm:$0xf]  ;;  %v3917_v19 = vld [vmem:[#allocation6 + $0x4] sm:$0xf0] }
  0xc4   :  { %v3147_v52 = vor.u32 %v3930_v48, %v3144_v51  ;;  %v3126_v60 = vld [vmem:[#allocation6 + $0x50] sm:$0xf]  ;;  %v3182_v47 = vld [vmem:[#allocation6 + $0xc0] sm:$0xf]  ;;  %v3941_v51 = vld [vmem:[#allocation6 + $0xc4] sm:$0xf0] }
  0xc5   :  { %v594_v62 = vadd.f32 %v593_v55, %v581_v53  ;;  %1059 = vmatmul.bf16.vlgmr.msra.gmra.mxu0 %v657_v59  ;;  %1149 = vmatpush.bf16.msrb.mxu3 %v3027_v28  ;;  %v3134_v53 = vld [vmem:[#allocation6 + $0x60] sm:$0xf]  ;;  %v3929_v55 = vld [vmem:[#allocation6 + $0x64] sm:$0xf0]  ;;  %v3127_v63 = vor.u32 %v3927_v61, %v3126_v60  ;;  %v3920_v28 = vld [vmem:[#allocation6 + $0x24] sm:$0xf] }
  0xc6   :  { %1359 = vmatpush.bf16.msra.mxu0 %v3143_v49  ;;  %v3135_v57 = vor.u32 %v3929_v55, %v3134_v53  ;;  %v3088_v53 = vld [vmem:[#allocation6 + $0x8] sm:$0xf0]  ;;  %v3174_v61 = vld [vmem:[#allocation6 + $0xb0] sm:$0xf] }
  0xc7   :  { %v650_v2 = vmul.f32 0.01, %v594_v62 }
  0xc9   :  { %v654_v6 = vmax.f32 %v594_v62, %v650_v2  ;;  %v3926_v62 = vld [vmem:[#allocation6 + $0x54] sm:$0xf]  ;;  %v3118_v2 = vld [vmem:[#allocation6 + $0x40] sm:$0xf] }
  0xca   :  { %v582_v9 = vpop.f32.mrf.mxu2  ;;  %1360 = vmatpush.bf16.msra.mxu0 %v3135_v57  ;;  %v3131_v1 = vor.u32 %v3926_v62, %v3128_v0  ;;  %v3119_v5 = vor.u32 %v3925_v3, %v3118_v2  ;;  %v3939_v62 = vld [vmem:[#allocation6 + $0xb4] sm:$0xf0]  ;;  %v3166_v3 = vld [vmem:[#allocation6 + $0xa0] sm:$0xf] }
  0xcb   :  { %v658_v14 = vpack.c.bf16 %v654_v6, %v654_v6  ;;  %v595_v15 = vpop.f32.mrf.mxu3  ;;  %v3120_v6 = vld [vmem:[#allocation6 + $0x48] sm:$0xf0]  ;;  %v3110_v9 = vld [vmem:[#allocation6 + $0x30] sm:$0xf]  ;;  %v3175_v0 = vor.u32 %v3939_v62, %v3174_v61  ;;  %v3959_v62 = vld [vmem:[#allocation7 + $0x54] sm:$0xf0] }
  0xcc   :  { %v3123_v8 = vor.u32 %v3924_v4, %v3120_v6  ;;  %v3111_v12 = vor.u32 %v3923_v10, %v3110_v9  ;;  %v3112_v15 = vld [vmem:[#allocation6 + $0x38] sm:$0xf0]  ;;  %v3937_v4 = vld [vmem:[#allocation6 + $0xa4] sm:$0xf0]  ;;  %v3168_v6 = vld [vmem:[#allocation6 + $0xa8] sm:$0xf0] }
  0xcd   :  { %1072 = vmatmul.bf16.vlgmr.msra.gmra.mxu1 %v658_v14  ;;  %v3254_v61 = vld [vmem:[#allocation7 + $0x50] sm:$0xf] }
  0xce   :  { %1361 = vmatpush.bf16.msra.mxu0 %v3127_v63  ;;  %1372 = vmatpush.bf16.msra.mxu1 %v3207_v16  ;;  %v3938_v63 = vld [vmem:[#allocation6 + $0xb4] sm:$0xf]  ;;  %v3160_v16 = vld [vmem:[#allocation6 + $0x98] sm:$0xf0] }
  0xd2   :  { %1362 = vmatpush.bf16.msra.mxu0 %v3119_v5  ;;  %1373 = vmatpush.bf16.msra.mxu1 %v3199_v27  ;;  %v3936_v5 = vld [vmem:[#allocation6 + $0xa4] sm:$0xf] }
  0xd3   :  { %v3171_v10 = vor.u32 %v3936_v5, %v3168_v6  ;;  %v3956_v5 = vld [vmem:[#allocation7 + $0x44] sm:$0xf] }
  0xd5   :  { %1111 = vmatmul.bf16.vlgmr.msrb.gmra.mxu0 %v657_v59  ;;  %v3139_v59 = vor.u32 %v3928_v56, %v3136_v58  ;;  %v3183_v56 = vor.u32 %v3941_v51, %v3182_v47  ;;  %v3940_v58 = vld [vmem:[#allocation6 + $0xc4] sm:$0xf]  ;;  %v3270_v47 = vld [vmem:[#allocation7 + $0x70] sm:$0xf] }
  0xd6   :  { %1363 = vmatpush.bf16.msra.mxu0 %v3111_v12  ;;  %v3158_v12 = vld [vmem:[#allocation6 + $0x90] sm:$0xf] }
  0xda   :  { %v606_v30 = vpop.f32.mrf.mxu0  ;;  %1364 = vmatpush.bf16.msra.mxu0 %v3103_v26  ;;  %v3152_v26 = vld [vmem:[#allocation6 + $0x88] sm:$0xf0] }
  0xdb   :  { %v607_v31 = vadd.f32 %v606_v30, %v212_v29  ;;  %v619_v32 = vpop.f32.mrf.mxu1  ;;  %v3104_v29 = vld [vmem:[#allocation6 + $0x28] sm:$0xf0]  ;;  %v3944_v30 = vld [vmem:[#allocation6 + $0xe4] sm:$0xf] }
  0xdd   :  { %v620_v33 = vadd.f32 %v619_v32, %v607_v31  ;;  %1124 = vmatmul.bf16.vlgmr.msrb.gmra.mxu1 %v658_v14  ;;  %v3922_v14 = vld [vmem:[#allocation6 + $0x34] sm:$0xf]  ;;  %v3107_v32 = vor.u32 %v3920_v28, %v3104_v29 }
  0xde   :  { %v3115_v17 = vor.u32 %v3922_v14, %v3112_v15  ;;  %v3934_v14 = vld [vmem:[#allocation6 + $0x94] sm:$0xf]  ;;  %v3159_v15 = vor.u32 %v3935_v13, %v3158_v12 }
  0xdf   :  { %v651_v35 = vmul.f32 0.01, %v620_v33  ;;  %v3163_v18 = vor.u32 %v3934_v14, %v3160_v16  ;;  %v3954_v12 = vld [vmem:[#allocation7 + $0x34] sm:$0xf]  ;;  %v3240_v14 = vld [vmem:[#allocation7 + $0x38] sm:$0xf0] }
  0xe0   :  { %v3230_v16 = vld [vmem:[#allocation7 + $0x20] sm:$0xf] }
  0xe1   :  { %v655_v50 = vmax.f32 %v620_v33, %v651_v35  ;;  %v3200_v33 = vld [vmem:[#allocation6 + $0xe8] sm:$0xf0] }
  0xe2   :  { %v632_v36 = vpop.f32.mrf.mxu2  ;;  %v608_v38 = vpop.f32.mrf.mxu0  ;;  %v3203_v35 = vor.u32 %v3944_v30, %v3200_v33 }
  0xe3   :  { %v633_v37 = vadd.f32 %v632_v36, %v213_v34  ;;  %v645_v54 = vpop.f32.mrf.mxu3  ;;  %v659_v39 = vpack.c.bf16 %v655_v50, %v655_v50  ;;  %v621_v40 = vpop.f32.mrf.mxu1  ;;  %v3094_v50 = vld [vmem:[#allocation6 + $0x10] sm:$0xf]  ;;  %v3919_v36 = vld [vmem:[#allocation6 + $0x14] sm:$0xf0] }
  0xe4   :  { %v3943_v38 = vld [vmem:[#allocation6 + $0xd4] sm:$0xf0]  ;;  %v3096_v40 = vld [vmem:[#allocation6 + $0x18] sm:$0xf0] }
  0xe5   :  { %v646_v41 = vadd.f32 %v645_v54, %v633_v37  ;;  %1085 = vmatmul.bf16.vlgmr.msra.gmra.mxu2 %v659_v39  ;;  %v3190_v37 = vld [vmem:[#allocation6 + $0xd0] sm:$0xf]  ;;  %v3095_v54 = vor.u32 %v3919_v36, %v3094_v50 }
  0xe6   :  { %1385 = vmatpush.bf16.msra.mxu2 %v3147_v52  ;;  %v3916_v52 = vld [vmem:[#allocation6 + $0x4] sm:$0xf] }
  0xe7   :  { %v652_v42 = vmul.f32 0.01, %v646_v41  ;;  %1365 = vmatpush.bf16.msra.mxu0 %v3095_v54  ;;  %v3091_v57 = vor.u32 %v3916_v52, %v3088_v53  ;;  %v3272_v52 = vld [vmem:[#allocation7 + $0x78] sm:$0xf0]  ;;  %v3262_v53 = vld [vmem:[#allocation7 + $0x60] sm:$0xf] }
  0xe9   :  { %v656_v43 = vmax.f32 %v646_v41, %v652_v42  ;;  %v3191_v41 = vor.u32 %v3943_v38, %v3190_v37 }
  0xea   :  { %v634_v44 = vpop.f32.mrf.mxu2  ;;  %1386 = vmatpush.bf16.msra.mxu2 %v3139_v59  ;;  %v3184_v59 = vld [vmem:[#allocation6 + $0xc8] sm:$0xf0] }
  0xeb   :  { %v660_v45 = vpack.c.bf16 %v656_v43, %v656_v43  ;;  %v647_v46 = vpop.f32.mrf.mxu3  ;;  %v3942_v43 = vld [vmem:[#allocation6 + $0xd4] sm:$0xf]  ;;  %v3192_v44 = vld [vmem:[#allocation6 + $0xd8] sm:$0xf0]  ;;  %1374 = vmatpush.bf16.msra.mxu1 %v3191_v41  ;;  %v3187_v60 = vor.u32 %v3940_v58, %v3184_v59  ;;  %v3264_v58 = vld [vmem:[#allocation7 + $0x68] sm:$0xf0] }
  0xec   :  { %v3086_v46 = vld [vmem:[#allocation6] sm:$0xf] }
  0xed   :  { %1098 = vmatmul.bf16.vlgmr.msra.gmra.mxu3 %v660_v45  ;;  %v3087_v49 = vor.u32 %v3917_v19, %v3086_v46 }
  0xee   :  { %1387 = vmatpush.bf16.msra.mxu2 %v3131_v1  ;;  %1398 = vmatpush.bf16.msra.mxu3 %v3211_v22  ;;  %v3176_v1 = vld [vmem:[#allocation6 + $0xb8] sm:$0xf0]  ;;  %v3932_v22 = vld [vmem:[#allocation6 + $0x84] sm:$0xf] }
  0xef   :  { %1366 = vmatpush.bf16.msra.mxu0 %v3087_v49  ;;  %1375 = vmatpush.bf16.msra.mxu1 %v3183_v56  ;;  %v3179_v2 = vor.u32 %v3938_v63, %v3176_v1  ;;  %v3155_v27 = vor.u32 %v3932_v22, %v3152_v26  ;;  %v3962_v49 = vld [vmem:[#allocation7 + $0x74] sm:$0xf]  ;;  %v3961_v56 = vld [vmem:[#allocation7 + $0x64] sm:$0xf0]  ;;  %v3256_v1 = vld [vmem:[#allocation7 + $0x58] sm:$0xf0]  ;;  %v3235_v22 = vor.u32 %v3952_v20, %v3232_v21 }
  0xf0   :  { %v3263_v59 = vor.u32 %v3961_v56, %v3262_v53  ;;  %v3958_v63 = vld [vmem:[#allocation7 + $0x54] sm:$0xf]  ;;  %v4022_v53 = vld [vmem:[#allocation9 + $0x1cc] sm:$0xf0]  ;;  %v3980_v21 = vld [vmem:[#allocation9 + $0x84] sm:$0xf] }
  0xf1   :  { %v4014_v20 = vld [vmem:[#allocation9 + $0x18c] sm:$0xf0] }
  0xf2   :  { %1388 = vmatpush.bf16.msra.mxu2 %v3123_v8  ;;  %1399 = vmatpush.bf16.msra.mxu3 %v3203_v35  ;;  %v3167_v8 = vor.u32 %v3937_v4, %v3166_v3  ;;  %v3246_v3 = vld [vmem:[#allocation7 + $0x40] sm:$0xf]  ;;  %v3957_v4 = vld [vmem:[#allocation7 + $0x44] sm:$0xf0] }
  0xf3   :  { %1376 = vmatpush.bf16.msra.mxu1 %v3175_v0  ;;  %v3255_v0 = vor.u32 %v3959_v62, %v3254_v61  ;;  %v3247_v6 = vor.u32 %v3957_v4, %v3246_v3  ;;  %v3504_v61 = vld [vmem:[#allocation9 + $0x1d0] sm:$0xf0]  ;;  %v3358_v62 = vld [vmem:[#allocation9 + $0xa0] sm:$0xf]  ;;  %v4018_v3 = vld [vmem:[#allocation9 + $0x1ac] sm:$0xf0] }
  0xf4   :  { %v3984_v4 = vld [vmem:[#allocation9 + $0xa4] sm:$0xf] }
  0xf5   :  { %1137 = vmatmul.bf16.vlgmr.msrb.gmra.mxu2 %v659_v39  ;;  %v3918_v39 = vld [vmem:[#allocation6 + $0x14] sm:$0xf] }
  0xf6   :  { %1389 = vmatpush.bf16.msra.mxu2 %v3115_v17  ;;  %v3099_v42 = vor.u32 %v3918_v39, %v3096_v40  ;;  %v725_v17 = vld [vmem:[%s4469_s5] sm:$0x3] }
  0xf7   :  { %1377 = vmatpush.bf16.msra.mxu1 %v3167_v8  ;;  %v727_v23 = vperm.slane %v725_v17, 0  ;;  %v728_v37 = vperm.slane %v725_v17, 1  ;;  %v3248_v8 = vld [vmem:[#allocation7 + $0x48] sm:$0xf0]  ;;  %v3953_v17 = vld [vmem:[#allocation7 + $0x24] sm:$0xf0] }
  0xfa   :  { %1390 = vmatpush.bf16.msra.mxu2 %v3107_v32 }
  0xfb   :  { %1378 = vmatpush.bf16.msra.mxu1 %v3159_v15  ;;  %v3243_v15 = vor.u32 %v3954_v12, %v3240_v14  ;;  %v3342_v14 = vld [vmem:[#allocation9 + $0x80] sm:$0xf] }
  0xfd   :  { %1150 = vmatmul.bf16.vlgmr.msrb.gmra.mxu3 %v660_v45  ;;  %v3195_v45 = vor.u32 %v3942_v43, %v3192_v44 }
  0xfe   :  { %1391 = vmatpush.bf16.msra.mxu2 %v3099_v42 }
  0xff   :  { %1400 = vmatpush.bf16.msra.mxu3 %v3195_v45  ;;  %1379 = vmatpush.bf16.msra.mxu1 %v3151_v25  ;;  %v3950_v25 = vld [vmem:[#allocation7 + $0x14] sm:$0xf] }
 0x102   :  { %1392 = vmatpush.bf16.msra.mxu2 %v3091_v57  ;;  %v3275_v57 = vor.u32 %v3962_v49, %v3272_v52  ;;  %v3502_v52 = vld [vmem:[#allocation9 + $0x1c0] sm:$0xf] }
 0x103   :  { %1401 = vmatpush.bf16.msra.mxu3 %v3187_v60 }
 0x104   :  { %1533 = vmatpush.bf16.msrb.mxu1 %v3275_v57  ;;  %v3503_v57 = vor.u32 %v4022_v53, %v3502_v52 }
 0x107   :  { %1402 = vmatpush.bf16.msra.mxu3 %v3179_v2  ;;  %v3259_v2 = vor.u32 %v3958_v63, %v3256_v1  ;;  %v3986_v63 = vld [vmem:[#allocation9 + $0xac] sm:$0xf0] }
 0x10b   :  { %1403 = vmatpush.bf16.msra.mxu3 %v3171_v10  ;;  %v3238_v10 = vld [vmem:[#allocation7 + $0x30] sm:$0xf] }
 0x10f   :  { %1404 = vmatpush.bf16.msra.mxu3 %v3163_v18  ;;  %v3231_v18 = vor.u32 %v3953_v17, %v3230_v16  ;;  %v3470_v16 = vld [vmem:[#allocation9 + $0x180] sm:$0xf] }
 0x113   :  { %1405 = vmatpush.bf16.msra.mxu3 %v3155_v27 }
 0x142   :  { %v4400_v7 = vpop.f32.mrf.mxu0 }
 0x143   :  { %v1061_v28 = vadd.f32 %v4400_v7, %v727_v23  ;;  %v3222_v23 = vld [vmem:[#allocation7 + $0x10] sm:$0xf] }
 0x14a   :  { %v4402_v31 = vpop.f32.mrf.mxu1  ;;  %v1062_v34 = vpop.f32.mrf.mxu0 }
 0x14b   :  { %v1074_v30 = vadd.f32 %v4402_v31, %v1061_v28  ;;  %v3224_v28 = vld [vmem:[#allocation7 + $0x18] sm:$0xf0] }
 0x152   :  { %v1075_v48 = vpop.f32.mrf.mxu1  ;;  %v1112_v55 = vpop.f32.mrf.mxu0 }
 0x153   :  { %v1113_v40 = vadd.f32 %v1112_v55, %v728_v37  ;;  %v3963_v48 = vld [vmem:[#allocation7 + $0x74] sm:$0xf0]  ;;  %v3960_v55 = vld [vmem:[#allocation7 + $0x64] sm:$0xf] }
 0x154   :  { %v3271_v51 = vor.u32 %v3963_v48, %v3270_v47  ;;  %v3267_v60 = vor.u32 %v3960_v55, %v3264_v58  ;;  %v3520_v47 = vld [vmem:[#allocation9 + $0x1f0] sm:$0xf0]  ;;  %v3374_v48 = vld [vmem:[#allocation9 + $0xc0] sm:$0xf]  ;;  %v3988_v55 = vld [vmem:[#allocation9 + $0xc4] sm:$0xf] }
 0x155   :  { %v3376_v58 = vld [vmem:[#allocation9 + $0xd0] sm:$0xf0] }
 0x156   :  { %1520 = vmatpush.bf16.msrb.mxu0 %v3271_v51  ;;  %1534 = vmatpush.bf16.msrb.mxu1 %v3267_v60  ;;  %v3990_v51 = vld [vmem:[#allocation9 + $0xcc] sm:$0xf0]  ;;  %v3379_v60 = vor.u32 %v3988_v55, %v3376_v58  ;;  %v3422_v58 = vld [vmem:[#allocation9 + $0x120] sm:$0xf] }
 0x157   :  { %v3375_v56 = vor.u32 %v3990_v51, %v3374_v48  ;;  %v4004_v48 = vld [vmem:[#allocation9 + $0x144] sm:$0xf]  ;;  %v1413_v51 = vld [vmem:[%s4465_s1] sm:$0xf]  ;;  %v3970_v55 = vld [vmem:[#allocation9 + $0x2c] sm:$0xf0] }
 0x15a   :  { %v1125_v9 = vpop.f32.mrf.mxu1  ;;  %v1114_v11 = vpop.f32.mrf.mxu0  ;;  %1521 = vmatpush.bf16.msrb.mxu0 %v3263_v59  ;;  %1535 = vmatpush.bf16.msrb.mxu1 %v3259_v2  ;;  %v4020_v59 = vld [vmem:[#allocation9 + $0x1c4] sm:$0xf]  ;;  %v3486_v2 = vld [vmem:[#allocation9 + $0x1a0] sm:$0xf] }
 0x15b   :  { %v1126_v41 = vadd.f32 %v1125_v9, %v1113_v40  ;;  %v3251_v9 = vor.u32 %v3956_v5, %v3248_v8  ;;  %v3955_v11 = vld [vmem:[#allocation7 + $0x34] sm:$0xf0]  ;;  %v3390_v40 = vld [vmem:[#allocation9 + $0xe0] sm:$0xf]  ;;  %v3507_v1 = vor.u32 %v4020_v59, %v3504_v61  ;;  %v3360_v8 = vld [vmem:[#allocation9 + $0xb0] sm:$0xf0]  ;;  %v3487_v12 = vor.u32 %v4018_v3, %v3486_v2 }
 0x15c   :  { %v3239_v13 = vor.u32 %v3955_v11, %v3238_v10  ;;  %v3488_v10 = vld [vmem:[#allocation9 + $0x1b0] sm:$0xf0]  ;;  %v3968_v61 = vld [vmem:[#allocation9 + $0x24] sm:$0xf] }
 0x15d   :  { %v3424_v2 = vld [vmem:[#allocation9 + $0x130] sm:$0xf0] }
 0x15e   :  { %1522 = vmatpush.bf16.msrb.mxu0 %v3255_v0  ;;  %1536 = vmatpush.bf16.msrb.mxu1 %v3251_v9  ;;  %v4016_v9 = vld [vmem:[#allocation9 + $0x1a4] sm:$0xf] }
 0x162   :  { %v1127_v24 = vpop.f32.mrf.mxu1  ;;  %1523 = vmatpush.bf16.msrb.mxu0 %v3247_v6  ;;  %1537 = vmatpush.bf16.msrb.mxu1 %v3243_v15  ;;  %v3359_v6 = vor.u32 %v3986_v63, %v3358_v62  ;;  %v3982_v15 = vld [vmem:[#allocation9 + $0x8c] sm:$0xf0]  ;;  %v3296_v62 = vld [vmem:[#allocation9 + $0x30] sm:$0xf0]  ;;  %v1414_v63 = vunpack.c.l.bf16 %v1413_v51  ;;  %v3985_v51 = vld [vmem:[#allocation9 + $0xac] sm:$0xf] }
 0x163   :  { %v3951_v24 = vld [vmem:[#allocation7 + $0x14] sm:$0xf0] }
 0x164   :  { %v3223_v27 = vor.u32 %v3951_v24, %v3222_v23  ;;  %v4012_v23 = vld [vmem:[#allocation9 + $0x184] sm:$0xf]  ;;  %v3472_v24 = vld [vmem:[#allocation9 + $0x190] sm:$0xf0] }
 0x166   :  { %1524 = vmatpush.bf16.msrb.mxu0 %v3239_v13  ;;  %1538 = vmatpush.bf16.msrb.mxu1 %v3235_v22  ;;  %v3363_v13 = vor.u32 %v3984_v4, %v3360_v8  ;;  %v3344_v22 = vld [vmem:[#allocation9 + $0x90] sm:$0xf0]  ;;  %v3966_v8 = vld [vmem:[#allocation9 + $0xc] sm:$0xf0] }
 0x168   :  { %v1086_v29 = vpop.f32.mrf.mxu2 }
 0x169   :  { %v1087_v32 = vadd.f32 %v1086_v29, %v1074_v30  ;;  %v3227_v29 = vor.u32 %v3950_v25, %v3224_v28  ;;  %v3214_v30 = vld [vmem:[#allocation7] sm:$0xf]  ;;  %v3343_v25 = vor.u32 %v3982_v15, %v3342_v14  ;;  %v3280_v14 = vld [vmem:[#allocation9 + $0x10] sm:$0xf0] }
 0x16a   :  { %1525 = vmatpush.bf16.msrb.mxu0 %v3231_v18  ;;  %v3491_v18 = vor.u32 %v4016_v9, %v3488_v10  ;;  %v3326_v28 = vld [vmem:[#allocation9 + $0x60] sm:$0xf] }
 0x16b   :  { %1539 = vmatpush.bf16.msrb.mxu1 %v3227_v29  ;;  %v3978_v29 = vld [vmem:[#allocation9 + $0x6c] sm:$0xf0]  ;;  %v3406_v9 = vld [vmem:[#allocation9 + $0x100] sm:$0xf] }
 0x16e   :  { %1526 = vmatpush.bf16.msrb.mxu0 %v3223_v27  ;;  %v3347_v27 = vor.u32 %v3980_v21, %v3344_v22  ;;  %v3398_v21 = vld [vmem:[#allocation9 + $0xe8] sm:$0xf]  ;;  %v3995_v22 = vld [vmem:[#allocation9 + $0xf4] sm:$0xf0] }
 0x170   :  { %v1099_v33 = vpop.f32.mrf.mxu3  ;;  %v1088_v35 = vpop.f32.mrf.mxu2 }
 0x171   :  { %v1100_v34 = vadd.f32 %v1099_v33, %v1087_v32  ;;  %v3949_v32 = vld [vmem:[#allocation7 + $0x4] sm:$0xf0]  ;;  %v3948_v33 = vld [vmem:[#allocation7 + $0x4] sm:$0xf]  ;;  %v3216_v35 = vld [vmem:[#allocation7 + $0x8] sm:$0xf0] }
 0x173   :  { %v1155_v50 = vmul.f32 0.01, %v1100_v34 }
 0x175   :  { %v1157_v36 = vmax.f32 %v1100_v34, %v1155_v50  ;;  %v3215_v34 = vor.u32 %v3949_v32, %v3214_v30  ;;  %v4412_v50 = vld [vmem:[%s4471_s7] sm:$0x3] }
 0x176   :  { %v3454_v30 = vld [vmem:[#allocation9 + $0x160] sm:$0xf] }
 0x177   :  { %v1159_v54 = vpack.c.bf16 %v1157_v36, %v1157_v36  ;;  %v3219_v36 = vor.u32 %v3948_v33, %v3216_v35  ;;  %1527 = vmatpush.bf16.msrb.mxu0 %v3215_v34  ;;  %v3475_v33 = vor.u32 %v4012_v23, %v3472_v24  ;;  %v4010_v34 = vld [vmem:[#allocation9 + $0x16c] sm:$0xf0]  ;;  %v3976_v35 = vld [vmem:[#allocation9 + $0x64] sm:$0xf]  ;;  %v3526_v23 = vld [vmem:[#allocation9 + $0x1e8] sm:$0xf] }
 0x178   :  { %v1101_v38 = vpop.f32.mrf.mxu3  ;;  %v1138_v39 = vpop.f32.mrf.mxu2 }
 0x179   :  { %1367 = vmatmul.bf16.vlgmr.msra.gmra.mxu0 %v1159_v54  ;;  %1393 = vmatmul.bf16.vlgmr.msra.gmra.mxu2 %v1159_v54  ;;  %v1139_v42 = vadd.f32 %v1138_v39, %v1126_v41  ;;  %v1195_v54 = vperm.slane %v4412_v50, 0  ;;  %v1196_v38 = vperm.slane %v4412_v50, 1  ;;  %v3994_v41 = vld [vmem:[#allocation9 + $0xec] sm:$0xf0] }
 0x17a   :  { %1540 = vmatpush.bf16.msrb.mxu1 %v3219_v36  ;;  %v3328_v36 = vld [vmem:[#allocation9 + $0x70] sm:$0xf0]  ;;  %v3974_v50 = vld [vmem:[#allocation9 + $0x4c] sm:$0xf0] }
 0x180   :  { %v1151_v7 = vpop.f32.mrf.mxu3  ;;  %v1140_v44 = vpop.f32.mrf.mxu2 }
 0x181   :  { %v1152_v43 = vadd.f32 %v1151_v7, %v1139_v42  ;;  %v3518_v42 = vld [vmem:[#allocation9 + $0x1e0] sm:$0xf]  ;;  %v3391_v7 = vor.u32 %v3994_v41, %v3390_v40  ;;  %v3992_v44 = vld [vmem:[#allocation9 + $0xe4] sm:$0xf]  ;;  %v3456_v40 = vld [vmem:[#allocation9 + $0x170] sm:$0xf0] }
 0x183   :  { %v1156_v45 = vmul.f32 0.01, %v1152_v43  ;;  %1946 = vmatpush.bf16.msrb.mxu2 %v3391_v7  ;;  %v3310_v7 = vld [vmem:[#allocation9 + $0x40] sm:$0xf] }
 0x184   :  { %v3311_v52 = vor.u32 %v3974_v50, %v3310_v7  ;;  %v3989_v7 = vld [vmem:[#allocation9 + $0xcc] sm:$0xf] }
 0x185   :  { %v1158_v31 = vmax.f32 %v1152_v43, %v1156_v45  ;;  %v4026_v43 = vld [vmem:[#allocation9 + $0x1ec] sm:$0xf0]  ;;  %v3392_v45 = vld [vmem:[#allocation9 + $0xf0] sm:$0xf0] }
 0x187   :  { %v1160_v46 = vpack.c.bf16 %v1158_v31, %v1158_v31  ;;  %v3519_v31 = vor.u32 %v4026_v43, %v3518_v42  ;;  %1947 = vmatpush.bf16.msrb.mxu2 %v3375_v56  ;;  %v3327_v42 = vor.u32 %v3978_v29, %v3326_v28 }
 0x188   :  { %v1153_v19 = vpop.f32.mrf.mxu3 }
 0x189   :  { %1380 = vmatmul.bf16.vlgmr.msra.gmra.mxu1 %v1160_v46  ;;  %1406 = vmatmul.bf16.vlgmr.msra.gmra.mxu3 %v1160_v46  ;;  %v3395_v46 = vor.u32 %v3992_v44, %v3392_v45  ;;  %v4024_v19 = vld [vmem:[#allocation9 + $0x1e4] sm:$0xf]  ;;  %v3455_v44 = vor.u32 %v4010_v34, %v3454_v30  ;;  %v3331_v45 = vor.u32 %v3976_v35, %v3328_v36  ;;  %v4025_v30 = vld [vmem:[#allocation9 + $0x1ec] sm:$0xf] }
 0x18a   :  { %v3523_v49 = vor.u32 %v4024_v19, %v3520_v47  ;;  %1959 = vmatpush.bf16.msrb.mxu3 %v3519_v31  ;;  %v3438_v31 = vld [vmem:[#allocation9 + $0x140] sm:$0xf]  ;;  %v3972_v19 = vld [vmem:[#allocation9 + $0x44] sm:$0xf]  ;;  %v3312_v47 = vld [vmem:[#allocation9 + $0x50] sm:$0xf0]  ;;  %v3399_v35 = vor.u32 %v3995_v22, %v3398_v21 }
 0x18b   :  { %1972 = vmatpush.bf16.msra.mxu0 %v3395_v46  ;;  %1948 = vmatpush.bf16.msrb.mxu2 %v3359_v6  ;;  %v3315_v56 = vor.u32 %v3972_v19, %v3312_v47  ;;  %v3278_v6 = vld [vmem:[#allocation9] sm:$0xf]  ;;  %v3987_v19 = vld [vmem:[#allocation9 + $0xb4] sm:$0xf0]  ;;  %v3318_v21 = vld [vmem:[#allocation9 + $0x48] sm:$0xf] }
 0x18c   :  { %1985 = vmatpush.bf16.msra.mxu1 %v3523_v49  ;;  %v3440_v49 = vld [vmem:[#allocation9 + $0x150] sm:$0xf0] }
 0x18d   :  { %v3443_v59 = vor.u32 %v4004_v48, %v3440_v49  ;;  %v3494_v48 = vld [vmem:[#allocation9 + $0x1a8] sm:$0xf]  ;;  %v4019_v49 = vld [vmem:[#allocation9 + $0x1b4] sm:$0xf0] }
 0x18e   :  { %1960 = vmatpush.bf16.msrb.mxu3 %v3503_v57  ;;  %v3294_v57 = vld [vmem:[#allocation9 + $0x20] sm:$0xf] }
 0x18f   :  { %1973 = vmatpush.bf16.msra.mxu0 %v3379_v60  ;;  %1949 = vmatpush.bf16.msrb.mxu2 %v3343_v25  ;;  %v4002_v60 = vld [vmem:[#allocation9 + $0x12c] sm:$0xf0]  ;;  %v3295_v3 = vor.u32 %v3970_v55, %v3294_v57  ;;  %v4027_v25 = vld [vmem:[#allocation9 + $0x1f4] sm:$0xf0]  ;;  %v3496_v57 = vld [vmem:[#allocation9 + $0x1b8] sm:$0xf0] }
 0x190   :  { %1986 = vmatpush.bf16.msra.mxu1 %v3507_v1  ;;  %v4000_v1 = vld [vmem:[#allocation9 + $0x124] sm:$0xf]  ;;  %v3423_v4 = vor.u32 %v4002_v60, %v3422_v58  ;;  %v3527_v36 = vor.u32 %v4027_v25, %v3526_v23  ;;  %v3983_v60 = vld [vmem:[#allocation9 + $0x94] sm:$0xf0] }
 0x191   :  { %v3975_v23 = vld [vmem:[#allocation9 + $0x54] sm:$0xf0] }
 0x192   :  { %1961 = vmatpush.bf16.msrb.mxu3 %v3487_v12  ;;  %v3998_v12 = vld [vmem:[#allocation9 + $0x10c] sm:$0xf0]  ;;  %v4007_v25 = vld [vmem:[#allocation9 + $0x154] sm:$0xf0] }
 0x193   :  { %1974 = vmatpush.bf16.msra.mxu0 %v3363_v13  ;;  %1950 = vmatpush.bf16.msrb.mxu2 %v3327_v42  ;;  %v3964_v13 = vld [vmem:[#allocation9 + $0x4] sm:$0xf]  ;;  %v3407_v28 = vor.u32 %v3998_v12, %v3406_v9  ;;  %v4023_v42 = vld [vmem:[#allocation9 + $0x1d4] sm:$0xf0] }
 0x194   :  { %1987 = vmatpush.bf16.msra.mxu1 %v3491_v18  ;;  %v3408_v18 = vld [vmem:[#allocation9 + $0x110] sm:$0xf0]  ;;  %v3283_v29 = vor.u32 %v3964_v13, %v3280_v14  ;;  %v3979_v9 = vld [vmem:[#allocation9 + $0x74] sm:$0xf0]  ;;  %v3977_v13 = vld [vmem:[#allocation9 + $0x6c] sm:$0xf] }
 0x195   :  { %v4011_v12 = vld [vmem:[#allocation9 + $0x174] sm:$0xf0]  ;;  %v3336_v14 = vld [vmem:[#allocation9 + $0x78] sm:$0xf0] }
 0x197   :  { %1975 = vmatpush.bf16.msra.mxu0 %v3347_v27  ;;  %1951 = vmatpush.bf16.msrb.mxu2 %v3311_v52  ;;  %v3400_v27 = vld [vmem:[#allocation9 + $0xf8] sm:$0xf0]  ;;  %v3495_v52 = vor.u32 %v4019_v49, %v3494_v48 }
 0x198   :  { %1988 = vmatpush.bf16.msra.mxu1 %v3475_v33  ;;  %v3416_v48 = vld [vmem:[#allocation9 + $0x118] sm:$0xf0] }
 0x19b   :  { %1976 = vmatpush.bf16.msra.mxu0 %v3331_v45  ;;  %1952 = vmatpush.bf16.msrb.mxu2 %v3295_v3  ;;  %v3512_v45 = vld [vmem:[#allocation9 + $0x1d8] sm:$0xf0] }
 0x19f   :  { %1977 = vmatpush.bf16.msra.mxu0 %v3315_v56  ;;  %v4017_v56 = vld [vmem:[#allocation9 + $0x1ac] sm:$0xf] }
 0x1a0   :  { %v3499_v58 = vor.u32 %v4017_v56, %v3496_v57  ;;  %v1434_v56 = vld [vmem:[%s4473_s9] sm:$0x3] }
 0x1a1   :  { %v1436_v57 = vperm.slane %v1434_v56, 0 }
 0x1f6   :  { %v1368_v26 = vpop.f32.mrf.mxu0 }
 0x1f7   :  { %v1369_v5 = vadd.f32 %v1368_v26, %v1195_v54  ;;  %v3471_v26 = vor.u32 %v4014_v20, %v3470_v16  ;;  %v3996_v16 = vld [vmem:[#allocation9 + $0x104] sm:$0xf]  ;;  %v3279_v20 = vor.u32 %v3966_v8, %v3278_v6  ;;  %v3334_v8 = vld [vmem:[#allocation9 + $0x68] sm:$0xf] }
 0x1f8   :  { %v3411_v34 = vor.u32 %v3996_v16, %v3408_v18  ;;  %v3339_v16 = vor.u32 %v3977_v13, %v3336_v14  ;;  %v4009_v18 = vld [vmem:[#allocation9 + $0x16c] sm:$0xf]  ;;  %v3646_v14 = vld [vmem:[#allocation10 + $0xe0] sm:$0xf] }
 0x1f9   :  { %1962 = vmatpush.bf16.msrb.mxu3 %v3471_v26  ;;  %v3993_v26 = vld [vmem:[#allocation9 + $0xec] sm:$0xf]  ;;  %1953 = vmatpush.bf16.msrb.mxu2 %v3279_v20  ;;  %v3464_v20 = vld [vmem:[#allocation9 + $0x178] sm:$0xf0] }
 0x1fa   :  { %v3467_v22 = vor.u32 %v4009_v18, %v3464_v20 }
 0x1fc   :  { %v4414_v37 = vpop.f32.mrf.mxu2 }
 0x1fd   :  { %v1395_v32 = vadd.f32 %v4414_v37, %v1196_v38  ;;  %v4006_v37 = vld [vmem:[#allocation9 + $0x14c] sm:$0xf0]  ;;  %1963 = vmatpush.bf16.msrb.mxu3 %v3455_v44  ;;  %v4021_v44 = vld [vmem:[#allocation9 + $0x1cc] sm:$0xf]  ;;  %1998 = vmatpush.bf16.msra.mxu2 %v3399_v35  ;;  %v3971_v35 = vld [vmem:[#allocation9 + $0x34] sm:$0xf0] }
 0x1fe   :  { %v1370_v39 = vpop.f32.mrf.mxu0  ;;  %v3439_v53 = vor.u32 %v4006_v37, %v3438_v31 }
 0x1ff   :  { %v4008_v39 = vld [vmem:[#allocation9 + $0x164] sm:$0xf] }
 0x200   :  { %v3459_v46 = vor.u32 %v4008_v39, %v3456_v40  ;;  %v3382_v39 = vld [vmem:[#allocation9 + $0xc8] sm:$0xf]  ;;  %v3991_v40 = vld [vmem:[#allocation9 + $0xd4] sm:$0xf0] }
 0x201   :  { %1964 = vmatpush.bf16.msrb.mxu3 %v3439_v53  ;;  %v3383_v50 = vor.u32 %v3991_v40, %v3382_v39  ;;  %v3368_v53 = vld [vmem:[#allocation9 + $0xb8] sm:$0xf0]  ;;  %v4003_v39 = vld [vmem:[#allocation9 + $0x134] sm:$0xf0]  ;;  %v3969_v40 = vld [vmem:[#allocation9 + $0x2c] sm:$0xf] }
 0x202   :  { %1989 = vmatpush.bf16.msra.mxu1 %v3459_v46  ;;  %v3366_v46 = vld [vmem:[#allocation9 + $0xa8] sm:$0xf]  ;;  %v3371_v55 = vor.u32 %v3985_v51, %v3368_v53 }
 0x203   :  { %1999 = vmatpush.bf16.msra.mxu2 %v3383_v50  ;;  %v3367_v47 = vor.u32 %v3987_v19, %v3366_v46  ;;  %v3965_v46 = vld [vmem:[#allocation9 + $0xc] sm:$0xf]  ;;  %v3288_v19 = vld [vmem:[#allocation9 + $0x18] sm:$0xf0] }
 0x204   :  { %v1396_v0 = vpop.f32.mrf.mxu2 }
 0x205   :  { %1965 = vmatpush.bf16.msrb.mxu3 %v3423_v4  ;;  %v4013_v4 = vld [vmem:[#allocation9 + $0x18c] sm:$0xf] }
 0x206   :  { %v1381_v11 = vpop.f32.mrf.mxu1  ;;  %1990 = vmatpush.bf16.msra.mxu1 %v3443_v59  ;;  %v3350_v59 = vld [vmem:[#allocation9 + $0x88] sm:$0xf] }
 0x207   :  { %v4418_v17 = vadd.f32 %v1381_v11, %v1369_v5  ;;  %v3299_v5 = vor.u32 %v3968_v61, %v3296_v62  ;;  %v3427_v11 = vor.u32 %v4000_v1, %v3424_v2  ;;  %2000 = vmatpush.bf16.msra.mxu2 %v3367_v47  ;;  %v3478_v61 = vld [vmem:[#allocation9 + $0x188] sm:$0xf]  ;;  %v3351_v62 = vor.u32 %v3983_v60, %v3350_v59  ;;  %v3352_v1 = vld [vmem:[#allocation9 + $0x98] sm:$0xf0]  ;;  %v3997_v47 = vld [vmem:[#allocation9 + $0x10c] sm:$0xf] }
 0x208   :  { %v3419_v53 = vor.u32 %v3997_v47, %v3416_v48  ;;  %v3622_v47 = vld [vmem:[#allocation10 + $0xb0] sm:$0xf] }
 0x209   :  { %2558 = vst [vmem:[%s4479_s15] sm:$0xff] %v4418_v17  ;;  %1978 = vmatpush.bf16.msra.mxu0 %v3299_v5  ;;  %1966 = vmatpush.bf16.msrb.mxu3 %v3407_v28  ;;  %v3480_v5 = vld [vmem:[#allocation9 + $0x198] sm:$0xf0]  ;;  %v3973_v28 = vld [vmem:[#allocation9 + $0x4c] sm:$0xf] }
 0x20a   :  { %1991 = vmatpush.bf16.msra.mxu1 %v3427_v11  ;;  %v3483_v6 = vor.u32 %v4013_v4, %v3480_v5  ;;  %v3335_v11 = vor.u32 %v3979_v9, %v3334_v8  ;;  %v3782_v4 = vld [vmem:[#allocation10 + $0x1f0] sm:$0xf]  ;;  %v4091_v8 = vld [vmem:[#allocation10 + $0x1f4] sm:$0xf0] }
 0x20b   :  { %2001 = vmatpush.bf16.msra.mxu2 %v3351_v62  ;;  %v3654_v62 = vld [vmem:[#allocation10 + $0xf0] sm:$0xf] }
 0x20c   :  { %v1407_v54 = vpop.f32.mrf.mxu3  ;;  %v3718_v9 = vld [vmem:[#allocation10 + $0x170] sm:$0xf] }
 0x20d   :  { %v1408_v41 = vadd.f32 %v1407_v54, %v1395_v32  ;;  %v3528_v32 = vld [vmem:[#allocation9 + $0x1f8] sm:$0xf0]  ;;  %v3403_v54 = vor.u32 %v3993_v26, %v3400_v27  ;;  %1979 = vmatpush.bf16.msra.mxu0 %v3283_v29  ;;  %2011 = vmatpush.bf16.msra.mxu3 %v3527_v36  ;;  %v3319_v26 = vor.u32 %v3975_v23, %v3318_v21  ;;  %v3582_v21 = vld [vmem:[#allocation10 + $0x60] sm:$0xf] }
 0x20e   :  { %v1383_v43 = vpop.f32.mrf.mxu1  ;;  %1992 = vmatpush.bf16.msra.mxu1 %v3411_v34  ;;  %v3320_v29 = vld [vmem:[#allocation9 + $0x58] sm:$0xf0]  ;;  %v3302_v34 = vld [vmem:[#allocation9 + $0x28] sm:$0xf]  ;;  %v3783_v23 = vor.u32 %v4091_v8, %v3782_v4  ;;  %v3542_v4 = vld [vmem:[#allocation10 + $0x10] sm:$0xf] }
 0x20f   :  { %v1411_v38 = vmul.f32 1.442695, %v1408_v41  ;;  %v3510_v41 = vld [vmem:[#allocation9 + $0x1c8] sm:$0xf]  ;;  %v3384_v43 = vld [vmem:[#allocation9 + $0xd8] sm:$0xf0]  ;;  %2002 = vmatpush.bf16.msra.mxu2 %v3335_v11 }
 0x210   :  { %v3511_v31 = vor.u32 %v4023_v42, %v3510_v41  ;;  %v3387_v37 = vor.u32 %v3989_v7, %v3384_v43  ;;  %v3303_v41 = vor.u32 %v3971_v35, %v3302_v34  ;;  %v4001_v42 = vld [vmem:[#allocation9 + $0x12c] sm:$0xf]  ;;  %v3432_v7 = vld [vmem:[#allocation9 + $0x138] sm:$0xf0]  ;;  %v3574_v34 = vld [vmem:[#allocation10 + $0x50] sm:$0xf] }
 0x211   :  { %4102 = vpow2.f32 %v1411_v38  ;;  %v3515_v38 = vor.u32 %v4021_v44, %v3512_v45  ;;  %v3286_v44 = vld [vmem:[#allocation9 + $0x8] sm:$0xf]  ;;  %v3967_v45 = vld [vmem:[#allocation9 + $0x14] sm:$0xf0] }
 0x212   :  { %2012 = vmatpush.bf16.msra.mxu3 %v3511_v31  ;;  %v3435_v31 = vor.u32 %v4001_v42, %v3432_v7  ;;  %v3287_v49 = vor.u32 %v3967_v45, %v3286_v44  ;;  %v4039_v35 = vld [vmem:[#allocation10 + $0x54] sm:$0xf0]  ;;  %v3630_v7 = vld [vmem:[#allocation10 + $0xc0] sm:$0xf]  ;;  %v4053_v44 = vld [vmem:[#allocation10 + $0xc4] sm:$0xf0] }
 0x213   :  { %2003 = vmatpush.bf16.msra.mxu2 %v3319_v26  ;;  %v4089_v26 = vld [vmem:[#allocation10 + $0x1e4] sm:$0xf0]  ;;  %v3566_v45 = vld [vmem:[#allocation10 + $0x40] sm:$0xf] }
 0x214   :  { %v1409_v0 = vpop.f32.mrf.mxu3 }
 0x215   :  { %v3981_v0 = vld [vmem:[#allocation9 + $0x8c] sm:$0xf] }
 0x216   :  { %2013 = vmatpush.bf16.msra.mxu3 %v3495_v52  ;;  %v3355_v3 = vor.u32 %v3981_v0, %v3352_v1  ;;  %v3291_v52 = vor.u32 %v3965_v46, %v3288_v19  ;;  %v4059_v1 = vld [vmem:[#allocation10 + $0xf4] sm:$0xf0]  ;;  %v4085_v46 = vld [vmem:[#allocation10 + $0x1c4] sm:$0xf0]  ;;  %v3631_v19 = vor.u32 %v4053_v44, %v3630_v7  ;;  %v4052_v44 = vld [vmem:[#allocation10 + $0xc4] sm:$0xf] }
 0x217   :  { %v4103_v10 = vpop.eup %4102  ;;  %2004 = vmatpush.bf16.msra.mxu2 %v3303_v41  ;;  %v3655_v13 = vor.u32 %v4059_v1, %v3654_v62  ;;  %v3702_v41 = vld [vmem:[#allocation10 + $0x150] sm:$0xf]  ;;  %v4033_v62 = vld [vmem:[#allocation10 + $0x24] sm:$0xf0]  ;;  %v4079_v7 = vld [vmem:[#allocation10 + $0x194] sm:$0xf0] }
 0x218   :  { %v1415_v15 = vmul.f32 %v4103_v10, %v1414_v63  ;;  %2559 = vst [vmem:[%s4479_s15 + $0x8] sm:$0xff] %v4103_v10  ;;  %v4015_v63 = vld [vmem:[#allocation9 + $0x194] sm:$0xf0]  ;;  %v3462_v10 = vld [vmem:[#allocation9 + $0x168] sm:$0xf] }
 0x219   :  { %v3479_v2 = vor.u32 %v4015_v63, %v3478_v61  ;;  %v3606_v1 = vld [vmem:[#allocation10 + $0x90] sm:$0xf] }
 0x21a   :  { %v1416_v24 = vadd.f32 %v1415_v15, %v4418_v17  ;;  %v3531_v17 = vor.u32 %v4025_v30, %v3528_v32  ;;  %v3463_v15 = vor.u32 %v4011_v12, %v3462_v10  ;;  %v4005_v30 = vld [vmem:[#allocation9 + $0x14c] sm:$0xf]  ;;  %v3323_v32 = vor.u32 %v3973_v28, %v3320_v29  ;;  %v4075_v10 = vld [vmem:[#allocation10 + $0x174] sm:$0xf0]  ;;  %v4073_v28 = vld [vmem:[#allocation10 + $0x164] sm:$0xf0] }
 0x21b   :  { %2014 = vmatpush.bf16.msra.mxu3 %v3479_v2  ;;  %2005 = vmatpush.bf16.msra.mxu2 %v3287_v49  ;;  %v3590_v2 = vld [vmem:[#allocation10 + $0x70] sm:$0xf]  ;;  %v4051_v49 = vld [vmem:[#allocation10 + $0xb4] sm:$0xf0] }
 0x21c   :  { %v1417_v33 = vpack.c.bf16 %v1416_v24, %v1416_v24  ;;  %v3446_v24 = vld [vmem:[#allocation9 + $0x148] sm:$0xf] }
 0x21d   :  { %v3447_v27 = vor.u32 %v4007_v25, %v3446_v24  ;;  %v3774_v24 = vld [vmem:[#allocation10 + $0x1e0] sm:$0xf]  ;;  %v3719_v25 = vor.u32 %v4075_v10, %v3718_v9  ;;  %v4045_v10 = vld [vmem:[#allocation10 + $0x84] sm:$0xf0] }
 0x21e   :  { %1528 = vmatmul.bf16.vlgmr.msrb.gmra.mxu0 %v1417_v33  ;;  %1541 = vmatmul.bf16.vlgmr.msrb.gmra.mxu1 %v1417_v33  ;;  %v3448_v33 = vld [vmem:[#allocation9 + $0x158] sm:$0xf0]  ;;  %v3598_v9 = vld [vmem:[#allocation10 + $0x80] sm:$0xf] }
 0x21f   :  { %2024 = vmatpush.bf16.msrb.mxu0 %v3403_v54  ;;  %2037 = vmatpush.bf16.msrb.mxu1 %v3531_v17  ;;  %v3451_v36 = vor.u32 %v4005_v30, %v3448_v33  ;;  %v3430_v54 = vld [vmem:[#allocation9 + $0x128] sm:$0xf]  ;;  %v3304_v17 = vld [vmem:[#allocation9 + $0x38] sm:$0xf0]  ;;  %v3638_v30 = vld [vmem:[#allocation10 + $0xd0] sm:$0xf] }
 0x220   :  { %2015 = vmatpush.bf16.msra.mxu3 %v3463_v15  ;;  %v3431_v43 = vor.u32 %v4003_v39, %v3430_v54  ;;  %v3307_v50 = vor.u32 %v3969_v40, %v3304_v17  ;;  %v4057_v15 = vld [vmem:[#allocation10 + $0xe4] sm:$0xf0]  ;;  %v3766_v54 = vld [vmem:[#allocation10 + $0x1d0] sm:$0xf]  ;;  %v4087_v40 = vld [vmem:[#allocation10 + $0x1d4] sm:$0xf0] }
 0x221   :  { %v3647_v29 = vor.u32 %v4057_v15, %v3646_v14  ;;  %v4071_v17 = vld [vmem:[#allocation10 + $0x154] sm:$0xf0]  ;;  %v3656_v14 = vld [vmem:[#allocation10 + $0xf8] sm:$0xf0]  ;;  %v4056_v15 = vld [vmem:[#allocation10 + $0xe4] sm:$0xf] }
 0x223   :  { %2025 = vmatpush.bf16.msrb.mxu0 %v3387_v37  ;;  %2038 = vmatpush.bf16.msrb.mxu1 %v3515_v38  ;;  %v3414_v37 = vld [vmem:[#allocation9 + $0x108] sm:$0xf]  ;;  %v3999_v38 = vld [vmem:[#allocation9 + $0x114] sm:$0xf0] }
 0x224   :  { %2016 = vmatpush.bf16.msra.mxu3 %v3447_v27  ;;  %v3415_v51 = vor.u32 %v3999_v38, %v3414_v37  ;;  %v3710_v27 = vld [vmem:[#allocation10 + $0x160] sm:$0xf]  ;;  %v3703_v37 = vor.u32 %v4071_v17, %v3702_v41  ;;  %v3584_v41 = vld [vmem:[#allocation10 + $0x68] sm:$0xf0] }
 0x225   :  { %v3711_v39 = vor.u32 %v4073_v28, %v3710_v27  ;;  %v3758_v38 = vld [vmem:[#allocation10 + $0x1c0] sm:$0xf] }
 0x227   :  { %2026 = vmatpush.bf16.msrb.mxu0 %v3371_v55  ;;  %2039 = vmatpush.bf16.msrb.mxu1 %v3499_v58  ;;  %v1437_v55 = vperm.slane %v1434_v56, 1  ;;  %v3750_v56 = vld [vmem:[#allocation10 + $0x1b0] sm:$0xf] }
 0x228   :  { %2017 = vmatpush.bf16.msra.mxu3 %v3431_v43  ;;  %v3575_v43 = vor.u32 %v4039_v35, %v3574_v34  ;;  %v3640_v34 = vld [vmem:[#allocation10 + $0xd8] sm:$0xf0] }
 0x22b   :  { %2027 = vmatpush.bf16.msrb.mxu0 %v3355_v3  ;;  %2040 = vmatpush.bf16.msrb.mxu1 %v3483_v6  ;;  %v4043_v3 = vld [vmem:[#allocation10 + $0x74] sm:$0xf0] }
 0x22c   :  { %2018 = vmatpush.bf16.msra.mxu3 %v3415_v51  ;;  %v3558_v51 = vld [vmem:[#allocation10 + $0x30] sm:$0xf] }
 0x22f   :  { %2028 = vmatpush.bf16.msrb.mxu0 %v3339_v16  ;;  %2041 = vmatpush.bf16.msrb.mxu1 %v3467_v22  ;;  %v3591_v16 = vor.u32 %v4043_v3, %v3590_v2  ;;  %v4041_v22 = vld [vmem:[#allocation10 + $0x64] sm:$0xf0]  ;;  %v4047_v3 = vld [vmem:[#allocation10 + $0x94] sm:$0xf0] }
 0x230   :  { %v3583_v33 = vor.u32 %v4041_v22, %v3582_v21  ;;  %v4029_v21 = vld [vmem:[#allocation10 + $0x4] sm:$0xf0]  ;;  %v3694_v22 = vld [vmem:[#allocation10 + $0x140] sm:$0xf] }
 0x233   :  { %2029 = vmatpush.bf16.msrb.mxu0 %v3323_v32  ;;  %2042 = vmatpush.bf16.msrb.mxu1 %v3451_v36  ;;  %v4055_v32 = vld [vmem:[#allocation10 + $0xd4] sm:$0xf0]  ;;  %v3775_v36 = vor.u32 %v4089_v26, %v3774_v24  ;;  %v4069_v24 = vld [vmem:[#allocation10 + $0x144] sm:$0xf0]  ;;  %v3592_v26 = vld [vmem:[#allocation10 + $0x78] sm:$0xf0] }
 0x234   :  { %v3639_v42 = vor.u32 %v4055_v32, %v3638_v30  ;;  %v3695_v27 = vor.u32 %v4069_v24, %v3694_v22  ;;  %v4081_v30 = vld [vmem:[#allocation10 + $0x1a4] sm:$0xf0] }
 0x237   :  { %2030 = vmatpush.bf16.msrb.mxu0 %v3307_v50  ;;  %2043 = vmatpush.bf16.msrb.mxu1 %v3435_v31  ;;  %v4037_v50 = vld [vmem:[#allocation10 + $0x44] sm:$0xf0]  ;;  %v3767_v31 = vor.u32 %v4087_v40, %v3766_v54  ;;  %v4067_v54 = vld [vmem:[#allocation10 + $0x134] sm:$0xf0]  ;;  %v4040_v40 = vld [vmem:[#allocation10 + $0x64] sm:$0xf] }
 0x238   :  { %v3567_v48 = vor.u32 %v4037_v50, %v3566_v45  ;;  %v3587_v17 = vor.u32 %v4040_v40, %v3584_v41  ;;  %v3632_v45 = vld [vmem:[#allocation10 + $0xc8] sm:$0xf0]  ;;  %v3544_v40 = vld [vmem:[#allocation10 + $0x18] sm:$0xf0]  ;;  %v4070_v41 = vld [vmem:[#allocation10 + $0x154] sm:$0xf] }
 0x239   :  { %v3635_v50 = vor.u32 %v4052_v44, %v3632_v45  ;;  %v3752_v44 = vld [vmem:[#allocation10 + $0x1b8] sm:$0xf0]  ;;  %v4452_v45 = vld [vmem:[%s4475_s11] sm:$0xf] }
 0x23b   :  { %2031 = vmatpush.bf16.msrb.mxu0 %v3291_v52  ;;  %2044 = vmatpush.bf16.msrb.mxu1 %v3419_v53  ;;  %v4035_v52 = vld [vmem:[#allocation10 + $0x34] sm:$0xf0]  ;;  %v3759_v53 = vor.u32 %v4085_v46, %v3758_v38  ;;  %v4038_v46 = vld [vmem:[#allocation10 + $0x54] sm:$0xf] }
 0x29b   :  { %v1529_v58 = vpop.f32.mrf.mxu0  ;;  %v1542_v59 = vpop.f32.mrf.mxu1 }
 0x29c   :  { %v1530_v60 = vadd.f32 %v1529_v58, %v1436_v57  ;;  %v1543_v61 = vadd.f32 %v1542_v59, %v1437_v55  ;;  %v4083_v57 = vld [vmem:[#allocation10 + $0x1b4] sm:$0xf0]  ;;  %v3623_v55 = vor.u32 %v4051_v49, %v3622_v47  ;;  %v3614_v58 = vld [vmem:[#allocation10 + $0xa0] sm:$0xf]  ;;  %v3559_v59 = vor.u32 %v4035_v52, %v3558_v51  ;;  %v4077_v49 = vld [vmem:[#allocation10 + $0x184] sm:$0xf0] }
 0x29d   :  { %v4050_v52 = vld [vmem:[#allocation10 + $0xb4] sm:$0xf] }
 0x29e   :  { %v1546_v63 = vmul.f32 0.01, %v1530_v60  ;;  %v1547_v0 = vmul.f32 0.01, %v1543_v61 }
 0x2a0   :  { %v1548_v5 = vmax.f32 %v1530_v60, %v1546_v63  ;;  %v1549_v6 = vmax.f32 %v1543_v61, %v1547_v0  ;;  %v4049_v60 = vld [vmem:[#allocation10 + $0xa4] sm:$0xf0]  ;;  %v3550_v61 = vld [vmem:[#allocation10 + $0x20] sm:$0xf]  ;;  %v3751_v63 = vor.u32 %v4083_v57, %v3750_v56  ;;  %v4090_v56 = vld [vmem:[#allocation10 + $0x1f4] sm:$0xf] }
 0x2a1   :  { %v3615_v0 = vor.u32 %v4049_v60, %v3614_v58  ;;  %v3551_v2 = vor.u32 %v4033_v62, %v3550_v61  ;;  %v3670_v58 = vld [vmem:[#allocation10 + $0x110] sm:$0xf]  ;;  %v4036_v62 = vld [vmem:[#allocation10 + $0x44] sm:$0xf] }
 0x2a2   :  { %v4437_v11 = vpack.c.bf16 %v1548_v5, %v1548_v5  ;;  %v4439_v12 = vpack.c.bf16 %v1549_v6, %v1549_v6  ;;  %v4031_v5 = vld [vmem:[#allocation10 + $0x14] sm:$0xf0]  ;;  %v3607_v6 = vor.u32 %v4047_v3, %v3606_v1  ;;  %v4048_v1 = vld [vmem:[#allocation10 + $0xa4] sm:$0xf] }
 0x2a3   :  { %v1531_v18 = vpop.f32.mrf.mxu0  ;;  %v1544_v20 = vpop.f32.mrf.mxu1  ;;  %v3543_v8 = vor.u32 %v4031_v5, %v3542_v4  ;;  %v4088_v3 = vld [vmem:[#allocation10 + $0x1e4] sm:$0xf]  ;;  %v3776_v5 = vld [vmem:[#allocation10 + $0x1e8] sm:$0xf0] }
 0x2a4   :  { %1954 = vmatmul.bf16.vlgmr.msrb.gmra.mxu2 %v4437_v11  ;;  %1967 = vmatmul.bf16.vlgmr.msrb.gmra.mxu3 %v4439_v12  ;;  %v3534_v20 = vld [vmem:[#allocation10] sm:$0xf] }
 0x2a5   :  { %1980 = vmatmul.bf16.vlgmr.msra.gmra.mxu0 %v4437_v11  ;;  %1993 = vmatmul.bf16.vlgmr.msra.gmra.mxu1 %v4439_v12 }
 0x2a6   :  { %2465 = vmatpush.bf16.msrb.mxu3 %v3655_v13  ;;  %2452 = vmatpush.bf16.msrb.mxu2 %v3591_v16  ;;  %v4058_v13 = vld [vmem:[#allocation10 + $0xf4] sm:$0xf]  ;;  %v3648_v16 = vld [vmem:[#allocation10 + $0xe8] sm:$0xf0] }
 0x2a7   :  { %2491 = vmatpush.bf16.msra.mxu1 %v3783_v23  ;;  %2478 = vmatpush.bf16.msra.mxu0 %v3719_v25  ;;  %v3651_v18 = vor.u32 %v4056_v15, %v3648_v16  ;;  %v3535_v23 = vor.u32 %v4029_v21, %v3534_v20  ;;  %v4042_v25 = vld [vmem:[#allocation10 + $0x74] sm:$0xf]  ;;  %v3720_v15 = vld [vmem:[#allocation10 + $0x178] sm:$0xf0] }
 0x2a8   :  { %v3595_v28 = vor.u32 %v4042_v25, %v3592_v26  ;;  %v3608_v20 = vld [vmem:[#allocation10 + $0x98] sm:$0xf0]  ;;  %v4086_v21 = vld [vmem:[#allocation10 + $0x1d4] sm:$0xf]  ;;  %v4032_v25 = vld [vmem:[#allocation10 + $0x24] sm:$0xf] }
 0x2a9   :  { %v3552_v26 = vld [vmem:[#allocation10 + $0x28] sm:$0xf0] }
 0x2aa   :  { %2466 = vmatpush.bf16.msrb.mxu3 %v3647_v29  ;;  %2453 = vmatpush.bf16.msrb.mxu2 %v3583_v33  ;;  %v3742_v29 = vld [vmem:[#allocation10 + $0x1a0] sm:$0xf]  ;;  %v4054_v33 = vld [vmem:[#allocation10 + $0xd4] sm:$0xf] }
 0x2ab   :  { %2492 = vmatpush.bf16.msra.mxu1 %v3775_v36  ;;  %2479 = vmatpush.bf16.msra.mxu0 %v3711_v39  ;;  %v3743_v32 = vor.u32 %v4081_v30, %v3742_v29  ;;  %v3643_v35 = vor.u32 %v4054_v33, %v3640_v34  ;;  %v3686_v36 = vld [vmem:[#allocation10 + $0x130] sm:$0xf]  ;;  %v3712_v29 = vld [vmem:[#allocation10 + $0x168] sm:$0xf0] }
 0x2ac   :  { %v3687_v39 = vor.u32 %v4067_v54, %v3686_v36  ;;  %v3600_v33 = vld [vmem:[#allocation10 + $0x88] sm:$0xf0] }
 0x2ad   :  { %v3760_v36 = vld [vmem:[#allocation10 + $0x1c8] sm:$0xf0] }
 0x2ae   :  { %2467 = vmatpush.bf16.msrb.mxu3 %v3639_v42  ;;  %2454 = vmatpush.bf16.msrb.mxu2 %v3575_v43  ;;  %v3734_v42 = vld [vmem:[#allocation10 + $0x190] sm:$0xf] }
 0x2af   :  { %2493 = vmatpush.bf16.msra.mxu1 %v3767_v31  ;;  %2480 = vmatpush.bf16.msra.mxu0 %v3703_v37  ;;  %v3735_v43 = vor.u32 %v4079_v7, %v3734_v42  ;;  %v3678_v31 = vld [vmem:[#allocation10 + $0x120] sm:$0xf]  ;;  %v4065_v37 = vld [vmem:[#allocation10 + $0x124] sm:$0xf0]  ;;  %v3704_v42 = vld [vmem:[#allocation10 + $0x158] sm:$0xf0] }
 0x2b0   :  { %v3679_v38 = vor.u32 %v4065_v37, %v3678_v31  ;;  %v3707_v7 = vor.u32 %v4070_v41, %v3704_v42  ;;  %v4028_v31 = vld [vmem:[#allocation10 + $0x4] sm:$0xf]  ;;  %v3536_v37 = vld [vmem:[#allocation10 + $0x8] sm:$0xf0] }
 0x2b2   :  { %2468 = vmatpush.bf16.msrb.mxu3 %v3631_v19  ;;  %2455 = vmatpush.bf16.msrb.mxu2 %v3567_v48  ;;  %v3576_v19 = vld [vmem:[#allocation10 + $0x58] sm:$0xf0]  ;;  %v3726_v48 = vld [vmem:[#allocation10 + $0x180] sm:$0xf] }
 0x2b3   :  { %2494 = vmatpush.bf16.msra.mxu1 %v3759_v53  ;;  %2481 = vmatpush.bf16.msra.mxu0 %v3695_v27  ;;  %v3579_v47 = vor.u32 %v4038_v46, %v3576_v19  ;;  %v3727_v51 = vor.u32 %v4077_v49, %v3726_v48  ;;  %v3624_v53 = vld [vmem:[#allocation10 + $0xb8] sm:$0xf0]  ;;  %v4072_v27 = vld [vmem:[#allocation10 + $0x164] sm:$0xf]  ;;  %v3539_v46 = vor.u32 %v4028_v31, %v3536_v37  ;;  %v3696_v19 = vld [vmem:[#allocation10 + $0x148] sm:$0xf0] }
 0x2b4   :  { %2006 = vmatmul.bf16.vlgmr.msra.gmra.mxu2 %v4437_v11  ;;  %2019 = vmatmul.bf16.vlgmr.msra.gmra.mxu3 %v4439_v12  ;;  %v3627_v57 = vor.u32 %v4050_v52, %v3624_v53  ;;  %v3715_v30 = vor.u32 %v4072_v27, %v3712_v29  ;;  %v4080_v49 = vld [vmem:[#allocation10 + $0x1a4] sm:$0xf]  ;;  %v4066_v53 = vld [vmem:[#allocation10 + $0x134] sm:$0xf]  ;;  %v1621_v29 = vperm.slane %v4452_v45, 3 }
 0x2b5   :  { %2032 = vmatmul.bf16.vlgmr.msrb.gmra.mxu0 %v4437_v11  ;;  %2045 = vmatmul.bf16.vlgmr.msrb.gmra.mxu1 %v4439_v12  ;;  %v3599_v11 = vor.u32 %v4045_v10, %v3598_v9  ;;  %v3659_v12 = vor.u32 %v4058_v13, %v3656_v14  ;;  %v4061_v9 = vld [vmem:[#allocation10 + $0x104] sm:$0xf0]  ;;  %v4034_v10 = vld [vmem:[#allocation10 + $0x34] sm:$0xf]  ;;  %v3560_v13 = vld [vmem:[#allocation10 + $0x38] sm:$0xf0] }
 0x2b6   :  { %2469 = vmatpush.bf16.msrb.mxu3 %v3623_v55  ;;  %2456 = vmatpush.bf16.msrb.mxu2 %v3559_v59  ;;  %v3784_v55 = vld [vmem:[#allocation10 + $0x1f8] sm:$0xf0]  ;;  %v4063_v59 = vld [vmem:[#allocation10 + $0x114] sm:$0xf0] }
 0x2b7   :  { %2495 = vmatpush.bf16.msra.mxu1 %v3751_v63  ;;  %2482 = vmatpush.bf16.msra.mxu0 %v3687_v39  ;;  %v3787_v60 = vor.u32 %v4090_v56, %v3784_v55  ;;  %v3671_v61 = vor.u32 %v4063_v59, %v3670_v58  ;;  %v3568_v63 = vld [vmem:[#allocation10 + $0x48] sm:$0xf0]  ;;  %v4030_v39 = vld [vmem:[#allocation10 + $0x14] sm:$0xf]  ;;  %v3688_v56 = vld [vmem:[#allocation10 + $0x138] sm:$0xf0] }
 0x2b8   :  { %v3691_v58 = vor.u32 %v4066_v53, %v3688_v56  ;;  %v4078_v59 = vld [vmem:[#allocation10 + $0x194] sm:$0xf]  ;;  %v2126_v53 = vld [vmem:[%s4477_s13] sm:$0x3] }
 0x2ba   :  { %2470 = vmatpush.bf16.msrb.mxu3 %v3615_v0  ;;  %2457 = vmatpush.bf16.msrb.mxu2 %v3551_v2  ;;  %v3571_v0 = vor.u32 %v4036_v62, %v3568_v63  ;;  %v3616_v2 = vld [vmem:[#allocation10 + $0xa8] sm:$0xf0] }
 0x2bb   :  { %2496 = vmatpush.bf16.msra.mxu1 %v3743_v32  ;;  %2483 = vmatpush.bf16.msra.mxu0 %v3679_v38  ;;  %v3619_v4 = vor.u32 %v4048_v1, %v3616_v2  ;;  %v4044_v32 = vld [vmem:[#allocation10 + $0x84] sm:$0xf]  ;;  %v1618_v1 = vperm.slane %v4452_v45, 0 }
 0x2bc   :  { %v3603_v34 = vor.u32 %v4044_v32, %v3600_v33  ;;  %v4068_v38 = vld [vmem:[#allocation10 + $0x144] sm:$0xf] }
 0x2bd   :  { %v3699_v48 = vor.u32 %v4068_v38, %v3696_v19  ;;  %v4076_v2 = vld [vmem:[#allocation10 + $0x184] sm:$0xf] }
 0x2be   :  { %2471 = vmatpush.bf16.msrb.mxu3 %v3607_v6  ;;  %2458 = vmatpush.bf16.msrb.mxu2 %v3543_v8  ;;  %v3662_v6 = vld [vmem:[#allocation10 + $0x100] sm:$0xf]  ;;  %v3779_v8 = vor.u32 %v4088_v3, %v3776_v5  ;;  %v3728_v3 = vld [vmem:[#allocation10 + $0x188] sm:$0xf0] }
 0x2bf   :  { %2497 = vmatpush.bf16.msra.mxu1 %v3735_v43  ;;  %2484 = vmatpush.bf16.msra.mxu0 %v3671_v61  ;;  %v3663_v14 = vor.u32 %v4061_v9, %v3662_v6  ;;  %v4082_v43 = vld [vmem:[#allocation10 + $0x1b4] sm:$0xf]  ;;  %v4064_v61 = vld [vmem:[#allocation10 + $0x124] sm:$0xf] }
 0x2c0   :  { %v4062_v6 = vld [vmem:[#allocation10 + $0x114] sm:$0xf] }
 0x2c2   :  { %2472 = vmatpush.bf16.msrb.mxu3 %v3599_v11  ;;  %2459 = vmatpush.bf16.msrb.mxu2 %v3535_v23  ;;  %v3563_v11 = vor.u32 %v4034_v10, %v3560_v13  ;;  %v3768_v23 = vld [vmem:[#allocation10 + $0x1d8] sm:$0xf0] }
 0x2c3   :  { %2498 = vmatpush.bf16.msra.mxu1 %v3727_v51  ;;  %2485 = vmatpush.bf16.msra.mxu0 %v3663_v14  ;;  %v3771_v24 = vor.u32 %v4086_v21, %v3768_v23  ;;  %v3744_v51 = vld [vmem:[#allocation10 + $0x1a8] sm:$0xf0]  ;;  %v3731_v14 = vor.u32 %v4076_v2, %v3728_v3  ;;  %v4060_v23 = vld [vmem:[#allocation10 + $0x104] sm:$0xf] }
 0x2c4   :  { %v3747_v52 = vor.u32 %v4080_v49, %v3744_v51 }
 0x2c6   :  { %2517 = vmatpush.bf16.msra.mxu3 %v3659_v12  ;;  %2504 = vmatpush.bf16.msra.mxu2 %v3595_v28  ;;  %v4074_v12 = vld [vmem:[#allocation10 + $0x174] sm:$0xf]  ;;  %v3555_v28 = vor.u32 %v4032_v25, %v3552_v26 }
 0x2c7   :  { %2543 = vmatpush.bf16.msrb.mxu1 %v3787_v60  ;;  %v3723_v16 = vor.u32 %v4074_v12, %v3720_v15  ;;  %v3736_v60 = vld [vmem:[#allocation10 + $0x198] sm:$0xf0] }
 0x2c8   :  { %v3739_v63 = vor.u32 %v4078_v59, %v3736_v60 }
 0x2c9   :  { %2530 = vmatpush.bf16.msrb.mxu0 %v3723_v16 }
 0x2ca   :  { %2518 = vmatpush.bf16.msra.mxu3 %v3651_v18  ;;  %2505 = vmatpush.bf16.msra.mxu2 %v3587_v17  ;;  %v4046_v18 = vld [vmem:[#allocation10 + $0x94] sm:$0xf]  ;;  %v3547_v17 = vor.u32 %v4030_v39, %v3544_v40 }
 0x2cb   :  { %2544 = vmatpush.bf16.msrb.mxu1 %v3779_v8  ;;  %v3611_v22 = vor.u32 %v4046_v18, %v3608_v20  ;;  %v3672_v8 = vld [vmem:[#allocation10 + $0x118] sm:$0xf0] }
 0x2cc   :  { %v3675_v15 = vor.u32 %v4062_v6, %v3672_v8 }
 0x2cd   :  { %2531 = vmatpush.bf16.msrb.mxu0 %v3715_v30 }
 0x2ce   :  { %2519 = vmatpush.bf16.msra.mxu3 %v3643_v35  ;;  %2506 = vmatpush.bf16.msra.mxu2 %v3579_v47  ;;  %v4084_v35 = vld [vmem:[#allocation10 + $0x1c4] sm:$0xf]  ;;  %v1619_v47 = vperm.slane %v4452_v45, 1 }
 0x2cf   :  { %2545 = vmatpush.bf16.msrb.mxu1 %v3771_v24  ;;  %v3763_v54 = vor.u32 %v4084_v35, %v3760_v36  ;;  %v3664_v24 = vld [vmem:[#allocation10 + $0x108] sm:$0xf0]  ;;  %v1620_v35 = vperm.slane %v4452_v45, 2 }
 0x2d0   :  { %v3667_v26 = vor.u32 %v4060_v23, %v3664_v24 }
 0x2d1   :  { %2532 = vmatpush.bf16.msrb.mxu0 %v3707_v7 }
 0x2d2   :  { %2520 = vmatpush.bf16.msra.mxu3 %v3635_v50  ;;  %2507 = vmatpush.bf16.msra.mxu2 %v3571_v0  ;;  %v3755_v50 = vor.u32 %v4082_v43, %v3752_v44  ;;  %v3680_v0 = vld [vmem:[#allocation10 + $0x128] sm:$0xf0] }
 0x2d3   :  { %2546 = vmatpush.bf16.msrb.mxu1 %v3763_v54  ;;  %v3683_v5 = vor.u32 %v4064_v61, %v3680_v0 }
 0x2d5   :  { %2533 = vmatpush.bf16.msrb.mxu0 %v3699_v48 }
 0x2d6   :  { %2521 = vmatpush.bf16.msra.mxu3 %v3627_v57  ;;  %2508 = vmatpush.bf16.msra.mxu2 %v3563_v11 }
 0x2d7   :  { %2547 = vmatpush.bf16.msrb.mxu1 %v3755_v50 }
 0x2d9   :  { %2534 = vmatpush.bf16.msrb.mxu0 %v3691_v58  ;;  %v2129_v58 = vperm.slane %v2126_v53, 1 }
 0x2da   :  { %2522 = vmatpush.bf16.msra.mxu3 %v3619_v4  ;;  %2509 = vmatpush.bf16.msra.mxu2 %v3555_v28 }
 0x2db   :  { %2548 = vmatpush.bf16.msrb.mxu1 %v3747_v52 }
 0x2dd   :  { %2535 = vmatpush.bf16.msrb.mxu0 %v3683_v5 }
 0x2de   :  { %2523 = vmatpush.bf16.msra.mxu3 %v3611_v22  ;;  %2510 = vmatpush.bf16.msra.mxu2 %v3547_v17 }
 0x2df   :  { %2549 = vmatpush.bf16.msrb.mxu1 %v3739_v63 }
 0x2e1   :  { %2536 = vmatpush.bf16.msrb.mxu0 %v3675_v15 }
 0x2e2   :  { %2524 = vmatpush.bf16.msra.mxu3 %v3603_v34  ;;  %2511 = vmatpush.bf16.msra.mxu2 %v3539_v46 }
 0x2e3   :  { %2550 = vmatpush.bf16.msrb.mxu1 %v3731_v14 }
 0x2e5   :  { %2537 = vmatpush.bf16.msrb.mxu0 %v3667_v26 }
 0x322   :  { %v1981_v57 = vpop.f32.mrf.mxu0  ;;  %v1994_v55 = vpop.f32.mrf.mxu1 }
 0x323   :  { %v1982_v62 = vadd.f32 %v1981_v57, %v1619_v47  ;;  %v2128_v57 = vperm.slane %v2126_v53, 0 }
 0x325   :  { %v1995_v4 = vadd.f32 %v1994_v55, %v1982_v62 }
 0x327   :  { %v2051_v9 = vmul.f32 0.01, %v1995_v4  ;;  %v1955_v10 = vpop.f32.mrf.mxu2  ;;  %v1968_v13 = vpop.f32.mrf.mxu3 }
 0x328   :  { %v1956_v11 = vadd.f32 %v1955_v10, %v1618_v1 }
 0x329   :  { %v2055_v12 = vmax.f32 %v1995_v4, %v2051_v9 }
 0x32a   :  { %v1969_v16 = vadd.f32 %v1968_v13, %v1956_v11  ;;  %v1983_v18 = vpop.f32.mrf.mxu0  ;;  %v1996_v20 = vpop.f32.mrf.mxu1 }
 0x32b   :  { %v2059_v21 = vpack.c.bf16 %v2055_v12, %v2055_v12 }
 0x32c   :  { %v2050_v22 = vmul.f32 0.01, %v1969_v16 }
 0x32d   :  { %2473 = vmatmul.bf16.vlgmr.msrb.gmra.mxu3 %v2059_v21 }
 0x32e   :  { %v2054_v25 = vmax.f32 %v1969_v16, %v2050_v22 }
 0x32f   :  { %v1957_v27 = vpop.f32.mrf.mxu2  ;;  %v1970_v28 = vpop.f32.mrf.mxu3 }
 0x330   :  { %v2058_v30 = vpack.c.bf16 %v2054_v25, %v2054_v25 }
 0x332   :  { %v2033_v32 = vpop.f32.mrf.mxu0  ;;  %v2046_v33 = vpop.f32.mrf.mxu1  ;;  %2460 = vmatmul.bf16.vlgmr.msrb.gmra.mxu2 %v2058_v30 }
 0x333   :  { %v2034_v34 = vadd.f32 %v2033_v32, %v1621_v29 }
 0x335   :  { %v2047_v36 = vadd.f32 %v2046_v33, %v2034_v34 }
 0x337   :  { %v2053_v54 = vmul.f32 0.01, %v2047_v36  ;;  %v2007_v39 = vpop.f32.mrf.mxu2  ;;  %v2020_v40 = vpop.f32.mrf.mxu3 }
 0x338   :  { %v2008_v41 = vadd.f32 %v2007_v39, %v1620_v35 }
 0x339   :  { %v2057_v17 = vmax.f32 %v2047_v36, %v2053_v54 }
 0x33a   :  { %v2021_v42 = vadd.f32 %v2020_v40, %v2008_v41  ;;  %v2035_v7 = vpop.f32.mrf.mxu0  ;;  %v2048_v43 = vpop.f32.mrf.mxu1 }
 0x33b   :  { %v2061_v44 = vpack.c.bf16 %v2057_v17, %v2057_v17 }
 0x33c   :  { %v2052_v50 = vmul.f32 0.01, %v2021_v42 }
 0x33d   :  { %2499 = vmatmul.bf16.vlgmr.msra.gmra.mxu1 %v2061_v44  ;;  %2525 = vmatmul.bf16.vlgmr.msra.gmra.mxu3 %v2059_v21 }
 0x33e   :  { %v2056_v31 = vmax.f32 %v2021_v42, %v2052_v50 }
 0x33f   :  { %v2009_v37 = vpop.f32.mrf.mxu2  ;;  %v2022_v38 = vpop.f32.mrf.mxu3 }
 0x340   :  { %v2060_v46 = vpack.c.bf16 %v2056_v31, %v2056_v31 }
 0x342   :  { %2486 = vmatmul.bf16.vlgmr.msra.gmra.mxu0 %v2060_v46  ;;  %2512 = vmatmul.bf16.vlgmr.msra.gmra.mxu2 %v2058_v30 }
 0x34d   :  { %2551 = vmatmul.bf16.vlgmr.msrb.gmra.mxu1 %v2061_v44 }
 0x352   :  { %2538 = vmatmul.bf16.vlgmr.msrb.gmra.mxu0 %v2060_v46 }
 0x3b0   :  { %v2474_v45 = vpop.f32.mrf.mxu3 }
 0x3b5   :  { %v2461_v19 = vpop.f32.mrf.mxu2 }
 0x3b6   :  { %v2462_v60 = vadd.f32 %v2461_v19, %v2128_v57 }
 0x3b8   :  { %v2476_v47 = vpop.f32.mrf.mxu3  ;;  %v2475_v0 = vadd.f32 %v2474_v45, %v2462_v60 }
 0x3ba   :  { %v2500_v48 = vpop.f32.mrf.mxu1 }
 0x3bd   :  { %v2463_v49 = vpop.f32.mrf.mxu2 }
 0x3bf   :  { %v2487_v51 = vpop.f32.mrf.mxu0 }
 0x3c0   :  { %v2526_v52 = vpop.f32.mrf.mxu3  ;;  %v2488_v2 = vadd.f32 %v2487_v51, %v2475_v0 }
 0x3c2   :  { %v2502_v56 = vpop.f32.mrf.mxu1  ;;  %v2501_v6 = vadd.f32 %v2500_v48, %v2488_v2 }
 0x3c5   :  { %v2513_v55 = vpop.f32.mrf.mxu2 }
 0x3c6   :  { %v2514_v62 = vadd.f32 %v2513_v55, %v2129_v58 }
 0x3c7   :  { %v2489_v59 = vpop.f32.mrf.mxu0 }
 0x3c8   :  { %v2528_v61 = vpop.f32.mrf.mxu3  ;;  %v2527_v3 = vadd.f32 %v2526_v52, %v2514_v62 }
 0x3ca   :  { %v2552_v63 = vpop.f32.mrf.mxu1 }
 0x3cd   :  { %v2515_v1 = vpop.f32.mrf.mxu2 }
 0x3cf   :  { %v2539_v4 = vpop.f32.mrf.mxu0 }
 0x3d0   :  { %v2540_v5 = vadd.f32 %v2539_v4, %v2527_v3 }
 0x3d2   :  { %v2553_v8 = vadd.f32 %v2552_v63, %v2540_v5  ;;  %v2554_v9 = vpop.f32.mrf.mxu1 }
 0x3d4   :  { %v2556_v10 = vpack.c.bf16 %v2553_v8, %v2501_v6 }
 0x3d6   :  { %2557 = vst [vmem:[%s4478_s14] sm:$0xff] %v2556_v10 }
 0x3d7   :  { %v2541_v13 = vpop.f32.mrf.mxu0 }
 0x3d8   :  { %2568 = vsyncpa [#allocation3], 1 }
 0x3d9   :  { %2569 = vsyncpa [#allocation5], 1 }
 0x3da   :  { %2570 = vsyncpa [#allocation8], 1 }
 0x3db   :  { %2571 = vsyncpa [#allocation11], 1 }

</bundles_post_ra>
